<compile_context>
chip_gen: v7x
topology: tpu7x:2x2x1
jax: 0.10.0
libtpu: 0.0.40
codegen_flags: <defaults>
</compile_context>

<pallas_src>
import functools
import math

import jax
import jax.numpy as jnp
from jax.experimental import pallas as pl
from jax.experimental.pallas import tpu as pltpu

_MIB = 1024 * 1024


def _round_up(x, m):
    return ((x + m - 1) // m) * m


def _cdiv(a, b):
    return (a + b - 1) // b


def _vmem_capacity_bytes():
    try:
        return int(pltpu.get_tpu_info().vmem_capacity_bytes)
    except Exception:
        return 64 * _MIB            # conservative (v7x-sized) fallback


def _pick_tn(H):
    for cand in (512, 256, 128):
        if H % cand == 0:
            return cand
    return H                        # tiny / odd hidden dim: single tile


# --------------------------------------------------------------------------
# Kernel: grid = (rows, hidden_tiles).  Step (i, j) consumes the (tm, D) row
# tile i (resident across j), the fused (D, 2*tn) w1/w3 tile j and the
# (tn, D) w2 tile j, and accumulates the partial down-projection into a
# f32 VMEM scratch.  Output written on the last hidden tile.
# --------------------------------------------------------------------------
def _ffn_kernel(x_ref, w13_ref, w2_ref, o_ref, acc_ref, *, tn):
    j = pl.program_id(1)

    @pl.when(j == 0)
    def _():
        acc_ref[...] = jnp.zeros_like(acc_ref)

    # x block index is (i, 0) for every j -> the tile stays resident; cast to
    # the MXU compute dtype in-kernel (cheap VPU op, no wrapper HBM pass).
    x = x_ref[...].astype(w13_ref.dtype)                      # (tm, D)

    # Fused w1/w3 projection: one MXU stream -> (tm, 2*tn) f32.
    h = jnp.dot(x, w13_ref[...], preferred_element_type=jnp.float32)
    h1 = h[:, :tn]                                            # x @ w1 tile
    h3 = h[:, tn:]                                            # x @ w3 tile

    # SiLU(h1) * h3 in f32 (VPU / EUP).
    gated = (h1 * jax.nn.sigmoid(h1)) * h3                    # (tm, tn) f32

    # Partial down-projection with f32 accumulation in VMEM scratch.
    acc_ref[...] += jnp.dot(gated.astype(w2_ref.dtype), w2_ref[...],
                            preferred_element_type=jnp.float32)

    @pl.when(j == pl.num_programs(1) - 1)
    def _():
        o_ref[...] = acc_ref[...].astype(o_ref.dtype)


# --------------------------------------------------------------------------
# One-time weight preparation (hoisted out of the per-call hot path).
# --------------------------------------------------------------------------
def prepare_ffn_weights(w1_t, w3_t, w2_t, *, tn=None,
                        compute_dtype=jnp.bfloat16):
    """w1_t/w3_t: (D, H); w2_t: (H, D)  (transposed vs. nn.Linear storage).

    Returns (w13, w2, tn): w13 is (D, 2*H) with per-`tn`-tile interleaving so
    grid block j (width 2*tn) is [w1[:, j*tn:(j+1)*tn] | w3[:, j*tn:(j+1)*tn]].
    Do this ONCE at weight-load time; do not re-run per forward call.
    """
    D, H = w1_t.shape
    if tn is None:
        tn = _pick_tn(H)
    assert H % tn == 0, "tn must divide the hidden dim"
    n_h = H // tn
    w13 = jnp.concatenate(
        [w1_t.astype(compute_dtype).reshape(D, n_h, tn),
         w3_t.astype(compute_dtype).reshape(D, n_h, tn)],
        axis=2,
    ).reshape(D, 2 * H)
    return w13, w2_t.astype(compute_dtype), tn


# --------------------------------------------------------------------------
# Tile / VMEM-budget selection.
# --------------------------------------------------------------------------
def _select_config(M, D, H, x_bytes, w_bytes, out_bytes, tm, tn):
    vmem_cap = _vmem_capacity_bytes()
    big_vmem = vmem_cap >= 100 * _MIB       # v5e/v6e (128 MiB) vs v7x (64 MiB)

    auto_tm = tm is None
    if tn is None:
        tn = _pick_tn(H)
    assert H % tn == 0, "tn must divide the hidden dim"

    M16 = _round_up(max(M, 1), 16)          # bf16 packs 2 rows per sublane
    if auto_tm:
        tm = 768 if big_vmem else 512       # weight-reuse roofline knee
    tm = min(_round_up(tm, 16), M16)
    if auto_tm:
        n_row = _cdiv(M16, tm)
        if n_row == 1 and tm > 256:
            n_row = 2                       # give v7x's second TensorCore work
        tm = max(16, _round_up(_cdiv(M16, n_row), 16))

    n_row = _cdiv(M16, tm)
    n_h = H // tn
    # Triple-buffer the streamed weights in the HBM-bound small-M (decode)
    # regime when VMEM is plentiful (v5e / v6e); skip on 64 MiB v7x.
    w_nbuf = 3 if (big_vmem and n_row <= 4 and n_h >= 2) else 2

    def footprint(tm_, tn_, nbuf_):
        return (tm_ * D * x_bytes * 2             # x tiles (double buffered)
                + D * 2 * tn_ * w_bytes * nbuf_   # fused w1|w3 tiles
                + tn_ * D * w_bytes * nbuf_       # w2 tiles
                + tm_ * D * out_bytes * 2         # output tiles
                + tm_ * D * 4)                    # f32 accumulator scratch

    budget = vmem_cap - 16 * _MIB              # headroom for compiler scratch
    while footprint(tm, tn, w_nbuf) > budget:
        if w_nbuf > 2:
            w_nbuf = 2
        elif tn > 128:
            tn //= 2
        elif tm > 128:
            tm = max(128, _round_up(tm // 2, 16))
        else:
            break

    n_row = _cdiv(M16, tm)
    M_pad = n_row * tm
    vmem_limit = int(max(32 * _MIB,
                         min(vmem_cap - 8 * _MIB,
                             footprint(tm, tn, w_nbuf) + 16 * _MIB)))
    return tm, tn, w_nbuf, M_pad, vmem_limit


# --------------------------------------------------------------------------
# Forward wrapper (hot path): only reshapes / pads x; weights come prepared.
# --------------------------------------------------------------------------
def feed_forward_pallas(x, w13, w2, tn, *, tm=None):
    """x: (B, S, D) activations (any float dtype).
    w13: (D, 2*H) fused, tn-interleaved w1|w3 from prepare_ffn_weights.
    w2:  (H, D) down-projection in the MXU compute dtype.
    tn:  hidden tile width used when building w13 (static Python int).
    Returns (B, S, D) in x.dtype.
    """
    B, S, D = x.shape
    H = w2.shape[0]
    assert w13.shape == (D, 2 * H)
    assert w2.shape == (H, D)
    M = B * S
    out_dtype = x.dtype
    x_bytes = jnp.dtype(x.dtype).itemsize
    w_bytes = jnp.dtype(w13.dtype).itemsize
    out_bytes = jnp.dtype(out_dtype).itemsize

    tm, tn, w_nbuf, M_pad, vmem_limit = _select_config(
        M, D, H, x_bytes, w_bytes, out_bytes, tm, tn)
    n_row = M_pad // tm
    n_h = H // tn

    x2 = x.reshape(M, D)
    if M_pad != M:
        x2 = jnp.pad(x2, ((0, M_pad - M), (0, 0)))   # zero rows -> zero output

    def _w_spec(shape, index_map):
        if w_nbuf > 2:
            try:
                return pl.BlockSpec(shape, index_map,
                                    pipeline_mode=pl.Buffered(w_nbuf))
            except TypeError:        # BlockSpec without pipeline_mode support
                pass
        return pl.BlockSpec(shape, index_map)

    cost = pl.CostEstimate(
        flops=int(6 * M_pad * D * H),                      # up + down matmuls
        transcendentals=int(M_pad * H),                    # sigmoid
        bytes_accessed=int(n_row * 3 * D * H * w_bytes     # weights re-streamed
                           + M_pad * D * (x_bytes + out_bytes)),
    )

    out2 = pl.pallas_call(
        functools.partial(_ffn_kernel, tn=tn),
        out_shape=jax.ShapeDtypeStruct((M_pad, D), out_dtype),
        grid_spec=pltpu.PrefetchScalarGridSpec(
            num_scalar_prefetch=0,
            grid=(n_row, n_h),                             # reduction axis last
            in_specs=[
                pl.BlockSpec((tm, D), lambda i, j: (i, 0)),        # x rows
                _w_spec((D, 2 * tn), lambda i, j: (0, j)),         # fused w1|w3
                _w_spec((tn, D), lambda i, j: (j, 0)),             # w2
            ],
            out_specs=pl.BlockSpec((tm, D), lambda i, j: (i, 0)),
            scratch_shapes=[pltpu.VMEM((tm, D), jnp.float32)],     # f32 acc
        ),
        compiler_params=pltpu.CompilerParams(
            dimension_semantics=("parallel", "arbitrary"),
            vmem_limit_bytes=vmem_limit,
        ),
        cost_estimate=cost,
    )(x2, w13, w2)

    if M_pad != M:
        out2 = out2[:M]
    return out2.reshape(B, S, D)


# --------------------------------------------------------------------------
# Parameter construction (mirrors FeedForward.__init__ hidden_dim math).
# --------------------------------------------------------------------------
def make_ffn_params(key, dim, multiple_of=256, ffn_dim_multiplier=None,
                    dtype=jnp.float32):
    hidden_dim = 4 * dim
    hidden_dim = int(2 * hidden_dim / 3)
    if ffn_dim_multiplier is not None:
        hidden_dim = int(ffn_dim_multiplier * hidden_dim)
    hidden_dim = multiple_of * ((hidden_dim + multiple_of - 1) // multiple_of)

    k1, k2, k3 = jax.random.split(key, 3)
    # nn.Linear default init: U(-1/sqrt(in), 1/sqrt(in)); weight is (out, in).
    # We store the transpose (in, out) directly.
    b1 = 1.0 / math.sqrt(dim)
    b2 = 1.0 / math.sqrt(hidden_dim)
    w1_t = jax.random.uniform(k1, (dim, hidden_dim), dtype, -b1, b1)
    w3_t = jax.random.uniform(k3, (dim, hidden_dim), dtype, -b1, b1)
    w2_t = jax.random.uniform(k2, (hidden_dim, dim), dtype, -b2, b2)
    return w1_t, w3_t, w2_t, hidden_dim


# Pure-JAX reference mirroring the kernel's numerics (bf16 MXU, f32 acc,
# f32 SiLU gate, bf16 re-cast before the down-projection).
def feed_forward_ref(x, w1_t, w3_t, w2_t, compute_dtype=jnp.bfloat16):
    xc = x.astype(compute_dtype)
    h1 = jnp.dot(xc, w1_t.astype(compute_dtype),
                 preferred_element_type=jnp.float32)
    h3 = jnp.dot(xc, w3_t.astype(compute_dtype),
                 preferred_element_type=jnp.float32)
    gated = (h1 * jax.nn.sigmoid(h1)) * h3
    out = jnp.dot(gated.astype(compute_dtype), w2_t.astype(compute_dtype),
                  preferred_element_type=jnp.float32)
    return out.astype(x.dtype)


if __name__ == "__main__":
    key = jax.random.PRNGKey(0)
    kx, kp = jax.random.split(key)

    # Small config with lane-dense D (multiple of 128): dim=128 -> hidden=512.
    B, S, D = 2, 100, 128          # B*S=200 exercises the ragged row-padding path
    w1_t, w3_t, w2_t, H = make_ffn_params(kp, D, multiple_of=256)
    x = jax.random.normal(kx, (B, S, D), jnp.float32)

    ref = feed_forward_ref(x, w1_t, w3_t, w2_t)

    # (1) Explicit small tiles: tm=128, tn=256 -> grid (2, 2), exercising both
    #     the parallel row axis and the hidden-reduction accumulator path.
    w13, w2c, tn = prepare_ffn_weights(w1_t, w3_t, w2_t, tn=256)
    out = jax.block_until_ready(feed_forward_pallas(x, w13, w2c, tn, tm=128))
    assert out.shape == (B, S, D)
    assert jnp.allclose(out, ref, atol=1e-2, rtol=1e-2), "mismatch (explicit tiles)"

    # (2) Auto config: tile sizes and vmem_limit_bytes derived from the
    #     device's VMEM capacity and the computed footprint.
    w13a, w2a, tna = prepare_ffn_weights(w1_t, w3_t, w2_t)
    out2 = jax.block_until_ready(feed_forward_pallas(x, w13a, w2a, tna))
    assert jnp.allclose(out2, ref, atol=1e-2, rtol=1e-2), "mismatch (auto tiles)"

    print("KERNEL_OK")
</pallas_src>

<mosaic_0001>
module attributes {stable_mosaic.version = 11 : i64} {
  func.func @_ffn_kernel(%arg0: i32, %arg1: i32, %arg2: memref<128x128xf32, #tpu.memory_space<vmem>>, %arg3: memref<128x512xbf16, #tpu.memory_space<vmem>>, %arg4: memref<256x128xbf16, #tpu.memory_space<vmem>>, %arg5: memref<128x128xf32, #tpu.memory_space<vmem>>, %arg6: memref<128x128xf32, #tpu.memory_space<vmem>>) attributes {dimension_semantics = [#tpu.dimension_semantics<parallel>, #tpu.dimension_semantics<arbitrary>], iteration_bounds = array<i64: 2, 2>, scalar_prefetch = 0 : i64, scratch_operands = 1 : i64, tpu.core_type = #tpu.core_type<tc>, window_params = [{transform_indices = @transform_0, window_bounds = array<i64: 128, 128>}, {transform_indices = @transform_1, window_bounds = array<i64: 128, 512>}, {transform_indices = @transform_2, window_bounds = array<i64: 256, 128>}, {transform_indices = @transform_3, window_bounds = array<i64: 128, 128>}]} {
    %c0_i32 = arith.constant 0 : i32
    %0 = arith.cmpi eq, %arg1, %c0_i32 : i32
    %1 = arith.extui %0 : i1 to i32
    %c0_i32_0 = arith.constant 0 : i32
    %2 = arith.cmpi ne, %1, %c0_i32_0 : i32
    scf.if %2 {
      %cst_13 = arith.constant 0.000000e+00 : f32
      %25 = vector.broadcast %cst_13 : f32 to vector<128x128xf32>
      %c0_14 = arith.constant 0 : index
      %c0_15 = arith.constant 0 : index
      %26 = vector.load %arg6[%c0_14, %c0_15] : memref<128x128xf32, #tpu.memory_space<vmem>>, vector<128x128xf32>
      tpu.vector_store %arg6[%c0_14, %c0_15], %25 {strides = array<i32>} : memref<128x128xf32, #tpu.memory_space<vmem>>, vector<128x128xf32>,
    } else {
    }
    %c0 = arith.constant 0 : index
    %c0_1 = arith.constant 0 : index
    %3 = vector.load %arg2[%c0, %c0_1] : memref<128x128xf32, #tpu.memory_space<vmem>>, vector<128x128xf32>
    %4 = arith.truncf %3 : vector<128x128xf32> to vector<128x128xbf16>
    %c0_2 = arith.constant 0 : index
    %c0_3 = arith.constant 0 : index
    %5 = vector.load %arg3[%c0_2, %c0_3] : memref<128x512xbf16, #tpu.memory_space<vmem>>, vector<128x512xbf16>
    %cst = arith.constant dense<0.000000e+00> : vector<128x512xf32>
    %6 = tpu.matmul %4, %5, %cst {dimension_numbers = #tpu.dot_dimension_numbers<[1], [0], [0], [1], [0, 0, 1, 1], [], []>} : vector<128x128xbf16>, vector<128x512xbf16>, vector<128x512xf32> -> vector<128x512xf32>
    %7 = vector.extract_strided_slice %6 {offsets = [0, 0], sizes = [128, 256], strides = [1, 1]} : vector<128x512xf32> to vector<128x256xf32>
    %8 = vector.extract_strided_slice %6 {offsets = [0, 256], sizes = [128, 256], strides = [1, 1]} : vector<128x512xf32> to vector<128x256xf32>
    %9 = arith.negf %7 : vector<128x256xf32>
    %10 = math.exp %9 : vector<128x256xf32>
    %cst_4 = arith.constant 1.000000e+00 : f32
    %11 = vector.broadcast %cst_4 : f32 to vector<128x256xf32>
    %12 = arith.addf %11, %10 : vector<128x256xf32>
    %13 = arith.divf %11, %12 : vector<128x256xf32>
    %14 = arith.mulf %7, %13 : vector<128x256xf32>
    %15 = arith.mulf %14, %8 : vector<128x256xf32>
    %c0_5 = arith.constant 0 : index
    %c0_6 = arith.constant 0 : index
    %16 = vector.load %arg6[%c0_5, %c0_6] : memref<128x128xf32, #tpu.memory_space<vmem>>, vector<128x128xf32>
    %17 = arith.truncf %15 : vector<128x256xf32> to vector<128x256xbf16>
    %c0_7 = arith.constant 0 : index
    %c0_8 = arith.constant 0 : index
    %18 = vector.load %arg4[%c0_7, %c0_8] : memref<256x128xbf16, #tpu.memory_space<vmem>>, vector<256x128xbf16>
    %cst_9 = arith.constant dense<0.000000e+00> : vector<128x128xf32>
    %19 = tpu.matmul %17, %18, %cst_9 {dimension_numbers = #tpu.dot_dimension_numbers<[1], [0], [0], [1], [0, 0, 1, 1], [], []>} : vector<128x256xbf16>, vector<256x128xbf16>, vector<128x128xf32> -> vector<128x128xf32>
    %20 = arith.addf %16, %19 : vector<128x128xf32>
    %c0_10 = arith.constant 0 : index
    %c0_11 = arith.constant 0 : index
    %21 = vector.load %arg6[%c0_10, %c0_11] : memref<128x128xf32, #tpu.memory_space<vmem>>, vector<128x128xf32>
    tpu.vector_store %arg6[%c0_10, %c0_11], %20 {strides = array<i32>} : memref<128x128xf32, #tpu.memory_space<vmem>>, vector<128x128xf32>,
    %c1_i32 = arith.constant 1 : i32
    %22 = arith.cmpi eq, %arg1, %c1_i32 : i32
    %23 = arith.extui %22 : i1 to i32
    %c0_i32_12 = arith.constant 0 : i32
    %24 = arith.cmpi ne, %23, %c0_i32_12 : i32
    scf.if %24 {
      %c0_13 = arith.constant 0 : index
      %c0_14 = arith.constant 0 : index
      %25 = vector.load %arg6[%c0_13, %c0_14] : memref<128x128xf32, #tpu.memory_space<vmem>>, vector<128x128xf32>
      %c0_15 = arith.constant 0 : index
      %c0_16 = arith.constant 0 : index
      %26 = vector.load %arg5[%c0_15, %c0_16] : memref<128x128xf32, #tpu.memory_space<vmem>>, vector<128x128xf32>
      tpu.vector_store %arg5[%c0_15, %c0_16], %25 {strides = array<i32>} : memref<128x128xf32, #tpu.memory_space<vmem>>, vector<128x128xf32>,
    } else {
    }
    return
  }
  func.func @transform_0(%arg0: i32, %arg1: i32) -> (i32, i32) {
    %c0_i32 = arith.constant 0 : i32
    %c0_i32_0 = arith.constant 0 : i32
    return %arg0, %c0_i32 : i32, i32
  }
  func.func @transform_1(%arg0: i32, %arg1: i32) -> (i32, i32) {
    %c0_i32 = arith.constant 0 : i32
    %c0_i32_0 = arith.constant 0 : i32
    return %c0_i32, %arg1 : i32, i32
  }
  func.func @transform_2(%arg0: i32, %arg1: i32) -> (i32, i32) {
    %c0_i32 = arith.constant 0 : i32
    %c0_i32_0 = arith.constant 0 : i32
    return %arg1, %c0_i32 : i32, i32
  }
  func.func @transform_3(%arg0: i32, %arg1: i32) -> (i32, i32) {
    %c0_i32 = arith.constant 0 : i32
    %c0_i32_0 = arith.constant 0 : i32
    return %arg0, %c0_i32 : i32, i32
  }
}

</mosaic_0001>

<bundles_post_ra>
// kernel: tpu_custom_call.1
= control target key start
LH: loop header
LB: loop body
LE: loop exit
PB: predicated region body
PF: predicated region fallthrough
CT: control target
= control target key end

     0   :  { %s2883_s0 = inlined_call_operand.hbm [shape: f32[256,128], index: 0, kind: input, shape index: {}]   ;;  %s2884_s1 = inlined_call_operand.hbm [shape: bf16[128,1024], index: 1, kind: input, shape index: {}]   ;;  %s2885_s2 = inlined_call_operand.hbm [shape: bf16[512,128], index: 2, kind: input, shape index: {}]   ;;  %s2886_s3 = inlined_call_operand.hbm [shape: f32[256,128], index: 3, kind: output, shape index: {}]  }
   0x1   :  { %2899 = sst [smem:[#allocation19_spill]] %s2883_s0 }
   0x2   :  { %2900 = sst [smem:[#allocation20_spill]] %s2884_s1 }
   0x3   :  { %2901 = sst [smem:[#allocation21_spill]] %s2886_s3 }
   0x4   :  { %8 = vsyncpa [#allocation4], 0 }
   0x5   :  { %10 = vsyncpa [#allocation4 + $0x1], 0 }
   0x6   :  { %11 = vsyncpa [#allocation7], 0 }
   0x7   :  { %13 = vsyncpa [#allocation7 + $0x1], 0 }
   0x8   :  { %14 = vsyncpa [#allocation5], 0 }
   0x9   :  { %16 = vsyncpa [#allocation5 + $0x1], 0  ;;  %s2224_s12 = smov 0   ;;  %s2226_s13 = smov 0  }
   0xa   :  { %s2228_s14 = smov 0   ;;  %s2230_s15 = smov 0  }
   0xb   :  { %s2232_s16 = smov 0   ;;  %s2234_s17 = smov 0  }
   0xc   :  { %s2236_s18 = smov 0   ;;  %s2238_s19 = smov 0  }
   0xd   :  { %s2240_s20 = smov 0   ;;  %s2242_s21 = smov 0  }
   0xe   :  { %s2244_s22 = smov 0  }
   0xf LB: > { %2902 = sst [smem:[#allocation13_spill]] %s2167_s17  ;;  %s31_s23 = sadd.s32 1, %s2179_s20  ;;  %s2187_s22 = sphi %s2244_s22, %s22_s22   ;;  %s2183_s21 = sphi %s2242_s21, %s2945_s21   ;;  %s2179_s20 = sphi %s2240_s20, %s2944_s20   ;;  %s2175_s19 = sphi %s2238_s19, %s2935_s19   ;;  %s2171_s18 = sphi %s2236_s18, %s2943_s18   ;;  %s2167_s17 = sphi %s2234_s17, %s2934_s17   ;;  %s2163_s16 = sphi %s2232_s16, %s2942_s16   ;;  %s2159_s15 = sphi %s2230_s15, %s2941_s15   ;;  %s2155_s14 = sphi %s2228_s14, %s2940_s14   ;;  %s2151_s13 = sphi %s2226_s13, %s2939_s13   ;;  %s2147_s12 = sphi %s2224_s12, %s2938_s12  }
  0x10   : > { %2903 = sst [smem:[#allocation14_spill]] %s2183_s21  ;;  %p2888_p0 = scmp.eq.s32.totalorder %s2187_s22, 0 }
  0x11   : > { %p2281_p1 = scmp.ge.s32.totalorder %s31_s23, 2  ;;  %s67_s25 = sadd.s32 1, %s2155_s14 }
  0x12   : > { %p74_p2 = scmp.ne.s32.totalorder %s2155_s14, %s2151_s13  ;;  %p2887_p5 = scmp.lt.s32.totalorder %s2187_s22, 4 }
  0x13   : > { %s2947_s23 = smov (%p2281_p1, %s31_s23), 0  ;;  %s177_s27 = sand.u32 1, %s2187_s22  }
  0x14   : > { %2905 = sst [smem:[#allocation15_spill]] %s2947_s23  ;;  %p76_p4 = por %p74_p2, %p2888_p0 }
  0x15   : > { %s64_s26 = ssub.s32 %s2179_s20, %s2947_s23  ;;  %s2889_s28 = sand.u32 1, %s2155_s14  }
  0x16   : > { %p65_p6 = scmp.eq.s32.totalorder %s64_s26, 0  ;;  %s1474_s30 = sshll.u32 %s2889_s28, 8 }
  0x17   : > { %s1573_s4 = sshll.u32 %s2179_s20, 8  ;;  %s2907_s1 = sld [smem:[#allocation20_spill]] }
  0x18   : > { %s2302_s29 = scalar_select %p65_p6, %s2155_s14, %s67_s25  }
  0x19   : > { %s181_s8 = scalar_lea.vmem [#allocation6], %s1474_s30  ;;  %p2314_p7 = pnand %p2887_p5, %p76_p4 }
  0x1a   : > { %2906 = sst [smem:[#allocation16_spill]] %s2302_s29  ;;  %s188_s9 = sshll.u32 %s181_s8, 4  ;;  %s2318_s9 = int_to_ptr.vmem [resolvable:$true] %s188_s9 }
  0x1b   : > { %s2321_s11 = scalar_lea.sflag [#allocation7], %s177_s27  ;;  %p2890_p10 = pneg %p2314_p7 }
  0x1d   : > { %s2310_s7 = scalar_lea.hbm %s2907_s1, %s1573_s4  ;;  %s1976_s4 = scalar_lea.hbm %s2907_s1, 8192 }
  0x1e   : > { %s1971_s25 = scalar_lea.hbm %s2310_s7, 4096  ;;  %p1977_p13 = scmp.lt.u32.totalorder %s2310_s7, %s2907_s1 }
  0x1f   : > { %p1972_p9 = scmp.ne.s32.totalorder %s2310_s7, %s1971_s25  ;;  %p1978_p2 = scmp.lt.u32.totalorder %s1976_s4, %s1971_s25 }
  0x20   : > { %p1980_p6 = scmp.lt.u32.totalorder %s1971_s25, %s2310_s7 }
  0x21   : > { %p1974_p11 = pnand %p2890_p10, %p1972_p9  ;;  %p1979_p4 = por %p1978_p2, %p1977_p13 }
  0x23   : > { %p1975_p12 = pneg %p1974_p11  ;;  %p1981_p5 = por %p1980_p6, %p1979_p4 }
  0x25   : > { %p1982_p3 = pnand %p1981_p5, %p1975_p12 }
  0x27   : > { %1985 = shalt.err (!%p1982_p3)
}
  0x28   : > { %s1986_s27 = scalar_lea.vmem %s2318_s9, 4096  ;;  %s2189_s8 = smov [#allocation6]  }
  0x29   : > { %p1987_p9 = scmp.ne.s32.totalorder %s2318_s9, %s1986_s27  ;;  %s1991_s26 = sshll.u32 %s2189_s8, 4  ;;  %s1992_s26 = int_to_ptr.vmem [resolvable:$false] %s1991_s26 }
  0x2a   : > { %s1993_s30 = scalar_lea.vmem %s1992_s26, 8192  ;;  %p1994_p8 = scmp.lt.s32.totalorder %s2318_s9, %s1992_s26 }
  0x2b   : > { %p1989_p11 = pnand %p1987_p9, %p2890_p10  ;;  %p1995_p13 = scmp.lt.s32.totalorder %s1993_s30, %s1986_s27 }
  0x2d   : > { %p1990_p0 = pneg %p1989_p11  ;;  %p1996_p2 = por %p1995_p13, %p1994_p8 }
  0x2f   : > { %p1997_p4 = pnand %p1996_p2, %p1990_p0 }
  0x31   : > { %2000 = shalt.err (!%p1997_p4)
}
  0x32   : > { %s2190_s25 = smov 512   ;;  %s2191_s4 = smov 256  }
  0x33   : > { %s2192_s5 = smov 16   ;;  %p217_p0 = scmp.lt.s32.totalorder %s2187_s22, 5 }
  0x34   : > { %1670 = dma.hbm_to_vmem [thread:$0]  (!%p2314_p7), %s2310_s7, 4096, %s2318_s9, %s2321_s11, %s2190_s25, %s2191_s4, %s2192_s5  }
  0x35   : > { %p2909_p3 = scmp.ge.s32.totalorder %s2187_s22, 1  ;;  %s2357_s27 = sadd.s32 4294967295, %s2187_s22  }
  0x36   : > { %s1468_s8 = sadd.s32 4294967294, %s2187_s22   ;;  %s34_s26 = sadd.s32 1, %s2183_s21 }
  0x37   : > { %p2352_p5 = pnand %p2909_p3, %p217_p0  ;;  %s41_s30 = sadd.s32 1, %s2167_s17 }
  0x38   : > { %s2949_s26 = smov (!%p2281_p1, %s34_s26), %s2183_s21  ;;  %p48_p8 = scmp.ne.s32.totalorder %s2167_s17, %s2163_s16 }
  0x39   : > { %s2910_s6 = scalar_select %p2352_p5, 1, 0 }
  0x3a   : > { %p54_p12 = scmp.ne.s32.totalorder %s2163_s16, %s2159_s15  ;;  %p36_p6 = scmp.ge.s32.totalorder %s2949_s26, 2 }
  0x3b   : > { %p55_p9 = scmp.eq.s32.totalorder %s2357_s27, 0  ;;  %p2911_p11 = scmp.eq.s32.totalorder %s2187_s22, 0 }
  0x3c   : > { %p130_p2 = scmp.eq.s32.totalorder %s2357_s27, 3  ;;  %s2951_s26 = smov (%p36_p6, %s2949_s26), 0 }
  0x3d   : > { %p2372_p13 = por %p2911_p11, %p48_p8  ;;  %2913 = sst [smem:[#allocation17_spill]] %s2951_s26 }
  0x3e   : > { %p2382_p1 = por %p55_p9, %p54_p12  ;;  %p2915_p4 = scmp.ne.s32.totalorder %s2151_s13, %s2147_s12 }
  0x3f   : > { %s38_s25 = ssub.s32 %s2183_s21, %s2951_s26  ;;  %p2395_p3 = por %p130_p2, %p48_p8 }
  0x40   : > { %s2914_s24 = scalar_select %p2382_p1, 1, 0 }
  0x41   : > { %p2389_p0 = por %p2915_p4, %p55_p9  ;;  %p39_p11 = scmp.eq.s32.totalorder %s38_s25, 0 }
  0x42   : > { %s2917_s4 = scalar_select %p2395_p3, 1, 0 }
  0x43   : > { %s2916_s9 = scalar_select %p2389_p0, 1, 0 }
  0x44   : > { %p136_p6 = scmp.eq.s32.totalorder %s1468_s8, 3  ;;  %s156_s5 = sand.u32 1, %s2167_s17  }
  0x45   : > { %s1572_s28 = sshll.u32 %s2183_s21, 11  ;;  %s1471_s12 = sshll.u32 %s156_s5, 7 }
  0x46   : > { %s2402_s1 = scalar_select %p39_p11, %s2167_s17, %s41_s30  }
  0x47   : > { %p2407_p10 = por %p136_p6, %p54_p12  ;;  %s2920_s0 = sld [smem:[#allocation19_spill]] }
  0x48   : > { %2918 = sst [smem:[#allocation18_spill]] %s2402_s1  ;;  %p2921_p8 = scmp.lt.s32.totalorder %s2187_s22, 4 }
  0x49   : > { %s2919_s23 = scalar_select %p2407_p10, 1, 0 }
  0x4a   : > { %p2420_p9 = pnand %p2921_p8, %p2372_p13  ;;  %s160_s30 = scalar_lea.vmem [#allocation3], %s1471_s12 }
  0x4b   : > { %s167_s25 = sshll.u32 %s160_s30, 4  ;;  %s2923_s21 = sand.u32 1, %s2155_s14   ;;  %s2424_s25 = int_to_ptr.vmem [resolvable:$true] %s167_s25 }
  0x4c   : > { %s2428_s3 = sshll.u32 %s2923_s21, 7  ;;  %p2003_p2 = pneg %p2420_p9 }
  0x4d   : > { %s2414_s26 = scalar_lea.hbm %s2920_s0, %s1572_s28  ;;  %s2430_s28 = scalar_lea.sflag [#allocation4], %s156_s5 }
  0x4e   : > { %s2001_s29 = scalar_lea.hbm %s2414_s26, 2048  ;;  %s2006_s12 = scalar_lea.hbm %s2920_s0, 4096 }
  0x4f   : > { %p2002_p12 = scmp.ne.s32.totalorder %s2414_s26, %s2001_s29  ;;  %p2007_p11 = scmp.lt.u32.totalorder %s2414_s26, %s2920_s0 }
  0x50   : > { %p2008_p6 = scmp.lt.u32.totalorder %s2006_s12, %s2001_s29  ;;  %p2010_p10 = scmp.lt.u32.totalorder %s2001_s29, %s2414_s26 }
  0x51   : > { %p2004_p13 = pnand %p2003_p2, %p2002_p12 }
  0x52   : > { %p2009_p8 = por %p2008_p6, %p2007_p11 }
  0x53   : > { %p2005_p4 = pneg %p2004_p13 }
  0x54   : > { %p2011_p3 = por %p2010_p10, %p2009_p8 }
  0x56   : > { %p2012_p0 = pnand %p2011_p3, %p2005_p4 }
  0x58   : > { %2015 = shalt.err (!%p2012_p0)
}
  0x59   : > { %s2016_s21 = scalar_lea.vmem %s2424_s25, 2048  ;;  %s2193_s1 = smov [#allocation3]  }
  0x5a   : > { %p2017_p12 = scmp.ne.s32.totalorder %s2424_s25, %s2016_s21  ;;  %s2021_s5 = sshll.u32 %s2193_s1, 4  ;;  %s2022_s5 = int_to_ptr.vmem [resolvable:$false] %s2021_s5 }
  0x5b   : > { %s2023_s17 = scalar_lea.vmem %s2022_s5, 4096  ;;  %p2024_p5 = scmp.lt.s32.totalorder %s2424_s25, %s2022_s5 }
  0x5c   : > { %p2019_p13 = pnand %p2017_p12, %p2003_p2  ;;  %p2025_p11 = scmp.lt.s32.totalorder %s2023_s17, %s2016_s21 }
  0x5e   : > { %p2020_p1 = pneg %p2019_p13  ;;  %p2026_p6 = por %p2025_p11, %p2024_p5 }
  0x60   : > { %p2027_p10 = pnand %p2026_p6, %p2020_p1 }
  0x62   : > { %2030 = shalt.err (!%p2027_p10)
}
  0x63   : > { %s2194_s29 = smov 128   ;;  %s2195_s7 = smov 8  }
  0x64   : > { %1667 = dma.hbm_to_vmem [thread:$0]  (!%p2420_p9), %s2414_s26, 2048, %s2424_s25, %s2430_s28, %s2194_s29, %s2194_s29, %s2195_s7  }
  0x65   : > { %s1574_s12 = sshll.u32 %s2179_s20, 11  ;;  %s202_s21 = scalar_lea.vmem [#allocation8], %s2428_s3 }
  0x66   : > { %s2462_s5 = scalar_lea.hbm %s2885_s2, %s1574_s12  ;;  %s209_s17 = sshll.u32 %s202_s21, 4  ;;  %s2465_s17 = int_to_ptr.vmem [resolvable:$true] %s209_s17 }
  0x67   : > { %s2031_s0 = scalar_lea.hbm %s2462_s5, 2048  ;;  %p2924_p1 = pneg %p2314_p7 }
  0x68   : > { %p2032_p5 = scmp.ne.s32.totalorder %s2462_s5, %s2031_s0  ;;  %s2036_s25 = scalar_lea.hbm %s2885_s2, 4096 }
  0x69   : > { %p2037_p9 = scmp.lt.u32.totalorder %s2462_s5, %s2885_s2  ;;  %p2038_p2 = scmp.lt.u32.totalorder %s2036_s25, %s2031_s0 }
  0x6a   : > { %p2034_p0 = pnand %p2032_p5, %p2924_p1  ;;  %p2040_p8 = scmp.lt.u32.totalorder %s2031_s0, %s2462_s5 }
  0x6b   : > { %p2039_p4 = por %p2038_p2, %p2037_p9 }
  0x6c   : > { %p2035_p3 = pneg %p2034_p0 }
  0x6d   : > { %p2041_p12 = por %p2040_p8, %p2039_p4 }
  0x6f   : > { %p2042_p13 = pnand %p2041_p12, %p2035_p3 }
  0x71   : > { %2045 = shalt.err (!%p2042_p13)
}
  0x72   : > { %s2046_s3 = scalar_lea.vmem %s2465_s17, 2048  ;;  %p2925_p6 = pmov %p2924_p1 }
  0x73   : > { %p2047_p11 = scmp.ne.s32.totalorder %s2465_s17, %s2046_s3  ;;  %s2196_s7 = smov [#allocation8]  }
  0x74   : > { %s2051_s12 = sshll.u32 %s2196_s7, 4  ;;  %s2052_s12 = int_to_ptr.vmem [resolvable:$false] %s2051_s12 }
  0x75   : > { %p2049_p10 = pnand %p2047_p11, %p2925_p6  ;;  %s2053_s30 = scalar_lea.vmem %s2052_s12, 4096 }
  0x76   : > { %p2054_p1 = scmp.lt.s32.totalorder %s2465_s17, %s2052_s12  ;;  %p2055_p0 = scmp.lt.s32.totalorder %s2053_s30, %s2046_s3 }
  0x77   : > { %p2050_p5 = pneg %p2049_p10 }
  0x78   : > { %p2056_p9 = por %p2055_p0, %p2054_p1 }
  0x7a   : > { %p2057_p2 = pnand %p2056_p9, %p2050_p5 }
  0x7c   : > { %2060 = shalt.err (!%p2057_p2)
}
  0x7d   : > { %s2197_s0 = smov 64   ;;  %s2198_s1 = smov 4  }
  0x7e   : > { %1673 = dma.hbm_to_vmem [thread:$0]  (!%p2314_p7), %s2462_s5, 2048, %s2465_s17, %s2321_s11, %s2197_s0, %s2197_s0, %s2198_s1  }
  0x7f   : > { %p2926_p3 = scmp.ne.s32.totalorder %s2910_s6, 0 }
  0x80   : > { %s2494_s21 = sand.u32 (!%p2926_p3), 1, %s2163_s16   ;;  %p2927_p4 = scmp.ne.s32.totalorder (!%p2926_p3), %s2914_s24, 0 }
  0x81   : > { %221 = sbr.rel (%p2926_p3) target bundleno = 775 (0x307), region = 32  ;;  %s1481_s26 = sshll.u32 (!%p2926_p3), %s2494_s21, 7 }
  0x82   : > { %s224_s8 = scalar_lea.sflag (!%p2926_p3), [#allocation4], %s2494_s21  ;;  %s2498_s25 = scalar_lea.vmem (!%p2926_p3), [#allocation3], %s1481_s26 }
  0x88   : > { %2134 = dma.done.wait (%p2927_p4), %s224_s8, 2048  }
  0x89   : > { %2136 = vsyncadd (%p2927_p4), %s224_s8, 4294965248  ;;  %s232_s10 = sand.u32 1, %s2357_s27   ;;  %s234_s11 = sand.u32 1, %s2151_s13  }
  0x8a   : > { %s1482_s6 = sshll.u32 %s234_s11, 8  ;;  %s233_s5 = scalar_lea.sflag [#allocation7], %s232_s10 }
  0x8b   : > { %s2506_s17 = scalar_lea.vmem [#allocation6], %s1482_s6  ;;  %p2928_p7 = scmp.ne.s32.totalorder %s2916_s9, 0 }
  0x8d   : > { %2138 = dma.done.wait (%p2928_p7), %s233_s5, 6144  }
  0x8e   : > { %2140 = vsyncadd (%p2928_p7), %s233_s5, 4294961152  ;;  %s1483_s28 = sshll.u32 %s234_s11, 7  ;;  %s2514_s3 = scalar_lea.vmem [#allocation9], %s1481_s26 }
  0x8f   : > { %s2512_s29 = scalar_lea.vmem [#allocation8], %s1483_s28  ;;  %p1485_p8 = scmp.ne.s32.totalorder %s2171_s18, 0 }
  0x90   : > { %v2199_v0 = vmov (!%p1485_p8), 0.0  }
  0x91   : > { %286 = sbr.rel (%p1485_p8) target bundleno = 153 (0x99), region = 48  ;;  %287 = vst [vmem:[#allocation2] sm:$0xff] (!%p1485_p8), %v2199_v0  ;;  %288 = vst [vmem:[#allocation2 + $0x8] sm:$0xff] (!%p1485_p8), %v2199_v0 }
  0x92   : > { %289 = vst [vmem:[#allocation2 + $0x10] sm:$0xff] (!%p1485_p8), %v2199_v0  ;;  %290 = vst [vmem:[#allocation2 + $0x18] sm:$0xff] (!%p1485_p8), %v2199_v0 }
  0x93   : > { %291 = vst [vmem:[#allocation2 + $0x20] sm:$0xff] (!%p1485_p8), %v2199_v0  ;;  %292 = vst [vmem:[#allocation2 + $0x28] sm:$0xff] (!%p1485_p8), %v2199_v0 }
  0x94   : > { %293 = vst [vmem:[#allocation2 + $0x30] sm:$0xff] (!%p1485_p8), %v2199_v0  ;;  %294 = vst [vmem:[#allocation2 + $0x38] sm:$0xff] (!%p1485_p8), %v2199_v0 }
  0x95   : > { %295 = vst [vmem:[#allocation2 + $0x40] sm:$0xff] (!%p1485_p8), %v2199_v0  ;;  %296 = vst [vmem:[#allocation2 + $0x48] sm:$0xff] (!%p1485_p8), %v2199_v0 }
  0x96   : > { %297 = vst [vmem:[#allocation2 + $0x50] sm:$0xff] (!%p1485_p8), %v2199_v0  ;;  %298 = vst [vmem:[#allocation2 + $0x58] sm:$0xff] (!%p1485_p8), %v2199_v0 }
  0x97   : > { %299 = vst [vmem:[#allocation2 + $0x60] sm:$0xff] (!%p1485_p8), %v2199_v0  ;;  %300 = vst [vmem:[#allocation2 + $0x68] sm:$0xff] (!%p1485_p8), %v2199_v0 }
  0x98   : > { %301 = vst [vmem:[#allocation2 + $0x70] sm:$0xff] %v2199_v0  ;;  %302 = vst [vmem:[#allocation2 + $0x78] sm:$0xff] %v2199_v0 }
  0x99 PF: > { %v1779_v1 = vld [vmem:[%s2506_s17 + $0x4] ss:$16 sps:$4 sm:$0xff]   ;;  %v1781_v2 = vld [vmem:[%s2506_s17] ss:$16 sps:$4 sm:$0xff]   ;;  %v2200_v3 = vmov 0   ;;  %v304_v19 = vld [vmem:[%s2498_s25 + $0x8] sm:$0xff] }
  0x9a   : > { %551 = vmatprep.mubr.bf16.mxu0 %v2200_v3  ;;  %591 = vmatprep.mubr.bf16.mxu1 %v2200_v3  ;;  %v1782_v4 = vld [vmem:[%s2506_s17 + $0x24] ss:$16 sps:$4 sm:$0xff]   ;;  %v1784_v5 = vld [vmem:[%s2506_s17 + $0x20] ss:$16 sps:$4 sm:$0xff]   ;;  %v312_v21 = vld [vmem:[%s2498_s25 + $0x48] sm:$0xff]  ;;  %p1566_p12 = scmp.ne.s32.totalorder %s2171_s18, 1 }
  0x9b   : > { %519 = vmatprep.subr.bf16.mxu0 %v1779_v1  ;;  %1640 = vmatprep.subr.bf16.mxu1 %v1779_v1  ;;  %v1785_v6 = vld [vmem:[%s2506_s17 + $0x44] ss:$16 sps:$4 sm:$0xff]   ;;  %v1787_v7 = vld [vmem:[%s2506_s17 + $0x40] ss:$16 sps:$4 sm:$0xff]   ;;  %v1805_v22 = vld [vmem:[%s2506_s17 + $0xc] ss:$16 sps:$4 sm:$0xff]  }
  0x9c   : > { %520 = vmatpush1.bf16.msra.mxu0 %v1781_v2  ;;  %1648 = vmatpush1.bf16.msra.mxu1 %v1781_v2  ;;  %v1788_v8 = vld [vmem:[%s2506_s17 + $0x64] ss:$16 sps:$4 sm:$0xff]   ;;  %v1790_v9 = vld [vmem:[%s2506_s17 + $0x60] ss:$16 sps:$4 sm:$0xff]   ;;  %v1803_v23 = vld [vmem:[%s2506_s17 + $0x8] ss:$16 sps:$4 sm:$0xff]  }
  0x9d   : > { %521 = vmatprep.subr.bf16.mxu0 %v1782_v4  ;;  %1641 = vmatprep.subr.bf16.mxu1 %v1782_v4  ;;  %v1791_v10 = vld [vmem:[%s2506_s17 + $0x84] ss:$16 sps:$4 sm:$0xff]   ;;  %v1793_v11 = vld [vmem:[%s2506_s17 + $0x80] ss:$16 sps:$4 sm:$0xff]   ;;  %v1808_v26 = vld [vmem:[%s2506_s17 + $0x2c] ss:$16 sps:$4 sm:$0xff]  }
  0x9e   : > { %v1794_v12 = vld [vmem:[%s2506_s17 + $0xa4] ss:$16 sps:$4 sm:$0xff]   ;;  %v1796_v13 = vld [vmem:[%s2506_s17 + $0xa0] ss:$16 sps:$4 sm:$0xff]   ;;  %v1806_v27 = vld [vmem:[%s2506_s17 + $0x28] ss:$16 sps:$4 sm:$0xff]  }
  0x9f   : > { %v1797_v14 = vld [vmem:[%s2506_s17 + $0xc4] ss:$16 sps:$4 sm:$0xff]   ;;  %v1799_v15 = vld [vmem:[%s2506_s17 + $0xc0] ss:$16 sps:$4 sm:$0xff]   ;;  %v306_v29 = vld [vmem:[%s2498_s25 + $0x18] sm:$0xff] }
  0xa0   : > { %522 = vmatpush1.bf16.msra.mxu0 %v1784_v5  ;;  %1649 = vmatpush1.bf16.msra.mxu1 %v1784_v5  ;;  %v1800_v16 = vld [vmem:[%s2506_s17 + $0xe4] ss:$16 sps:$4 sm:$0xff]   ;;  %v1802_v17 = vld [vmem:[%s2506_s17 + $0xe0] ss:$16 sps:$4 sm:$0xff]   ;;  %v314_v31 = vld [vmem:[%s2498_s25 + $0x58] sm:$0xff] }
  0xa1   : > { %523 = vmatprep.subr.bf16.mxu0 %v1785_v6  ;;  %1642 = vmatprep.subr.bf16.mxu1 %v1785_v6  ;;  %v303_v18 = vld [vmem:[%s2498_s25] sm:$0xff]  ;;  %v305_v28 = vld [vmem:[%s2498_s25 + $0x10] sm:$0xff]  ;;  %v1811_v32 = vld [vmem:[%s2506_s17 + $0x4c] ss:$16 sps:$4 sm:$0xff]  }
  0xa2   : > { %v311_v20 = vld [vmem:[%s2498_s25 + $0x40] sm:$0xff]  ;;  %v2541_v24 = vpack.c.bf16 %v304_v19, %v303_v18  ;;  %v313_v30 = vld [vmem:[%s2498_s25 + $0x50] sm:$0xff]  ;;  %v320_v33 = vpack.c.bf16 %v306_v29, %v305_v28  ;;  %v1809_v35 = vld [vmem:[%s2506_s17 + $0x48] ss:$16 sps:$4 sm:$0xff]  }
  0xa3   : > { %v2543_v25 = vpack.c.bf16 %v312_v21, %v311_v20  ;;  %v324_v34 = vpack.c.bf16 %v314_v31, %v313_v30  ;;  %v1814_v36 = vld [vmem:[%s2506_s17 + $0x6c] ss:$16 sps:$4 sm:$0xff]   ;;  %v1812_v37 = vld [vmem:[%s2506_s17 + $0x68] ss:$16 sps:$4 sm:$0xff]   ;;  %v307_v38 = vld [vmem:[%s2498_s25 + $0x20] sm:$0xff] }
  0xa4   : > { %524 = vmatpush1.bf16.msra.mxu0 %v1787_v7  ;;  %1650 = vmatpush1.bf16.msra.mxu1 %v1787_v7  ;;  %v308_v39 = vld [vmem:[%s2498_s25 + $0x28] sm:$0xff]  ;;  %v315_v40 = vld [vmem:[%s2498_s25 + $0x60] sm:$0xff]  ;;  %v309_v48 = vld [vmem:[%s2498_s25 + $0x30] sm:$0xff] }
  0xa5   : > { %525 = vmatprep.subr.bf16.mxu0 %v1788_v8  ;;  %1643 = vmatprep.subr.bf16.mxu1 %v1788_v8  ;;  %v316_v41 = vld [vmem:[%s2498_s25 + $0x68] sm:$0xff]  ;;  %v321_v43 = vpack.c.bf16 %v308_v39, %v307_v38  ;;  %v310_v49 = vld [vmem:[%s2498_s25 + $0x38] sm:$0xff]  ;;  %v317_v50 = vld [vmem:[%s2498_s25 + $0x70] sm:$0xff] }
  0xa6   : > { %v1817_v42 = vld [vmem:[%s2506_s17 + $0x8c] ss:$16 sps:$4 sm:$0xff]   ;;  %v325_v44 = vpack.c.bf16 %v316_v41, %v315_v40  ;;  %v1815_v45 = vld [vmem:[%s2506_s17 + $0x88] ss:$16 sps:$4 sm:$0xff]   ;;  %v322_v53 = vpack.c.bf16 %v310_v49, %v309_v48  ;;  %v1827_v58 = vld [vmem:[%s2512_s29 + $0x40] sm:$0xff]  }
  0xa7   : > { %v1820_v46 = vld [vmem:[%s2506_s17 + $0xac] ss:$16 sps:$4 sm:$0xff]   ;;  %v1818_v47 = vld [vmem:[%s2506_s17 + $0xa8] ss:$16 sps:$4 sm:$0xff]   ;;  %v1828_v59 = vld [vmem:[%s2512_s29] sm:$0xff]  }
  0xa8   : > { %526 = vmatpush1.bf16.msra.mxu0 %v1790_v9  ;;  %1651 = vmatpush1.bf16.msra.mxu1 %v1790_v9  ;;  %v318_v51 = vld [vmem:[%s2498_s25 + $0x78] sm:$0xff]  ;;  %v1829_v60 = vld [vmem:[%s2512_s29 + $0x48] sm:$0xff]   ;;  %v1831_v62 = vld [vmem:[%s2512_s29 + $0x50] sm:$0xff]  }
  0xa9   : > { %527 = vmatprep.subr.bf16.mxu0 %v1791_v10  ;;  %1644 = vmatprep.subr.bf16.mxu1 %v1791_v10  ;;  %v1823_v52 = vld [vmem:[%s2506_s17 + $0xcc] ss:$16 sps:$4 sm:$0xff]   ;;  %v326_v54 = vpack.c.bf16 %v318_v51, %v317_v50  ;;  %v1821_v55 = vld [vmem:[%s2506_s17 + $0xc8] ss:$16 sps:$4 sm:$0xff]   ;;  %v1832_v63 = vld [vmem:[%s2512_s29 + $0x10] sm:$0xff]  }
  0xaa   : > { %v1826_v56 = vld [vmem:[%s2506_s17 + $0xec] ss:$16 sps:$4 sm:$0xff]   ;;  %v1824_v57 = vld [vmem:[%s2506_s17 + $0xe8] ss:$16 sps:$4 sm:$0xff]   ;;  %v1835_v2 = vld [vmem:[%s2512_s29 + $0x60] sm:$0xff]  }
  0xab   : > { %v1830_v61 = vld [vmem:[%s2512_s29 + $0x8] sm:$0xff]   ;;  %v1833_v0 = vld [vmem:[%s2512_s29 + $0x58] sm:$0xff]   ;;  %v1839_v6 = vld [vmem:[%s2512_s29 + $0x70] sm:$0xff]  }
  0xac   : > { %528 = vmatpush1.bf16.msra.mxu0 %v1793_v11  ;;  %1652 = vmatpush1.bf16.msra.mxu1 %v1793_v11  ;;  %v1834_v1 = vld [vmem:[%s2512_s29 + $0x18] sm:$0xff]   ;;  %v1837_v4 = vld [vmem:[%s2512_s29 + $0x68] sm:$0xff]   ;;  %v1840_v7 = vld [vmem:[%s2512_s29 + $0x30] sm:$0xff]  }
  0xad   : > { %529 = vmatprep.subr.bf16.mxu0 %v1794_v12  ;;  %1645 = vmatprep.subr.bf16.mxu1 %v1794_v12  ;;  %v1838_v5 = vld [vmem:[%s2512_s29 + $0x28] sm:$0xff]   ;;  %v1841_v8 = vld [vmem:[%s2512_s29 + $0x78] sm:$0xff]  }
  0xae   : > { %v1842_v9 = vld [vmem:[%s2512_s29 + $0x38] sm:$0xff]  }
  0xb0   : > { %530 = vmatpush1.bf16.msra.mxu0 %v1796_v13  ;;  %1653 = vmatpush1.bf16.msra.mxu1 %v1796_v13 }
  0xb1   : > { %531 = vmatprep.subr.bf16.mxu0 %v1797_v14  ;;  %1646 = vmatprep.subr.bf16.mxu1 %v1797_v14 }
  0xb4   : > { %532 = vmatpush1.bf16.msra.mxu0 %v1799_v15  ;;  %1654 = vmatpush1.bf16.msra.mxu1 %v1799_v15 }
  0xb5   : > { %533 = vmatprep.subr.bf16.mxu0 %v1800_v16  ;;  %1647 = vmatprep.subr.bf16.mxu1 %v1800_v16 }
  0xb8   : > { %534 = vmatpush1.bf16.msra.mxu0 %v1802_v17  ;;  %1655 = vmatpush1.bf16.msra.mxu1 %v1802_v17 }
  0xb9   : > { %632 = vmatprep.subr.bf16.mxu1 %v1805_v22  ;;  %1576 = vmatprep.subr.bf16.mxu0 %v1827_v58 }
  0xbb   : > { %552 = vmatmul.mubr.bf16.vlgmr.msra.gmra.mrb[0].mxu0 %v2541_v24  ;;  %592 = vmatmul.mubr.bf16.vlgmr.msra.gmra.mrb[0].mxu1 %v2543_v25 }
  0xbc   : > { %633 = vmatpush1.bf16.msra.mxu1 %v1803_v23  ;;  %561 = vmatprep.mubr.bf16.mxu0 %v2200_v3 }
  0xbd   : > { %634 = vmatprep.subr.bf16.mxu1 %v1808_v26  ;;  %601 = vmatprep.mubr.bf16.mxu1 %v2200_v3 }
  0xbe   : > { %1577 = vmatpush3.bf16.msra.mxu0 %v1828_v59 }
  0xbf   : > { %1578 = vmatprep.subr.bf16.mxu0 %v1829_v60 }
  0xc0   : > { %635 = vmatpush1.bf16.msra.mxu1 %v1806_v27 }
  0xc1   : > { %636 = vmatprep.subr.bf16.mxu1 %v1811_v32 }
  0xc2   : > { %1579 = vmatpush3.bf16.msra.mxu0 %v1830_v61 }
  0xc3   : > { %562 = vmatmul.mubr.bf16.gmra.mrb[4].mxu0 %v320_v33  ;;  %602 = vmatmul.mubr.bf16.gmra.mrb[4].mxu1 %v324_v34 }
  0xc4   : > { %637 = vmatpush1.bf16.msra.mxu1 %v1809_v35  ;;  %571 = vmatprep.mubr.bf16.mxu0 %v2200_v3 }
  0xc5   : > { %638 = vmatprep.subr.bf16.mxu1 %v1814_v36  ;;  %611 = vmatprep.mubr.bf16.mxu1 %v2200_v3 }
  0xc6   : > { %1580 = vmatprep.subr.bf16.mxu0 %v1831_v62 }
  0xc7   : > { %1581 = vmatpush3.bf16.msra.mxu0 %v1832_v63 }
  0xc8   : > { %639 = vmatpush1.bf16.msra.mxu1 %v1812_v37  ;;  %1582 = vmatprep.subr.bf16.mxu0 %v1833_v0 }
  0xc9   : > { %640 = vmatprep.subr.bf16.mxu1 %v1817_v42 }
  0xcb   : > { %572 = vmatmul.mubr.bf16.gmra.mrb[8].mxu0 %v321_v43  ;;  %612 = vmatmul.mubr.bf16.gmra.mrb[8].mxu1 %v325_v44 }
  0xcc   : > { %641 = vmatpush1.bf16.msra.mxu1 %v1815_v45  ;;  %581 = vmatprep.mubr.bf16.mxu0 %v2200_v3 }
  0xcd   : > { %642 = vmatprep.subr.bf16.mxu1 %v1820_v46  ;;  %621 = vmatprep.mubr.bf16.mxu1 %v2200_v3 }
  0xce   : > { %1583 = vmatpush3.bf16.msra.mxu0 %v1834_v1 }
  0xcf   : > { %1584 = vmatprep.subr.bf16.mxu0 %v1835_v2 }
  0xd0   : > { %643 = vmatpush1.bf16.msra.mxu1 %v1818_v47 }
  0xd1   : > { %644 = vmatprep.subr.bf16.mxu1 %v1823_v52 }
  0xd3   : > { %582 = vmatmul.mubr.bf16.gmra.mrb[12].mxu0 %v322_v53  ;;  %622 = vmatmul.mubr.bf16.gmra.mrb[12].mxu1 %v326_v54 }
  0xd4   : > { %645 = vmatpush1.bf16.msra.mxu1 %v1821_v55  ;;  %664 = vmatprep.mubr.bf16.mxu1 %v2200_v3 }
  0xd5   : > { %646 = vmatprep.subr.bf16.mxu1 %v1826_v56 }
  0xd8   : > { %647 = vmatpush1.bf16.msra.mxu1 %v1824_v57 }
  0xdb   : > { %665 = vmatmul.mubr.bf16.vlgmr.msra.gmra.mrb[16].mxu1 %v2541_v24 }
  0xdc   : > { %674 = vmatprep.mubr.bf16.mxu1 %v2200_v3 }
  0xe3   : > { %675 = vmatmul.mubr.bf16.gmra.mrb[20].mxu1 %v320_v33 }
  0xe4   : > { %684 = vmatprep.mubr.bf16.mxu1 %v2200_v3 }
  0xeb   : > { %685 = vmatmul.mubr.bf16.gmra.mrb[24].mxu1 %v321_v43 }
  0xec   : > { %694 = vmatprep.mubr.bf16.mxu1 %v2200_v3 }
  0xf3   : > { %695 = vmatmul.mubr.bf16.gmra.mrb[28].mxu1 %v322_v53 }
  0xf4   : > { %704 = vmatprep.mubr.bf16.mxu1 %v2200_v3 }
  0xfb   : > { %705 = vmatmul.mubr.bf16.gmra.mrb[32].mxu1 %v2543_v25 }
  0xfc   : > { %714 = vmatprep.mubr.bf16.mxu1 %v2200_v3 }
 0x103   : > { %715 = vmatmul.mubr.bf16.gmra.mrb[36].mxu1 %v324_v34 }
 0x104   : > { %724 = vmatprep.mubr.bf16.mxu1 %v2200_v3 }
 0x10b   : > { %725 = vmatmul.mubr.bf16.gmra.mrb[40].mxu1 %v325_v44 }
 0x10c   : > { %734 = vmatprep.mubr.bf16.mxu1 %v2200_v3  ;;  %v1836_v3 = vld [vmem:[%s2512_s29 + $0x20] sm:$0xff]  }
 0x10d   : > { %1585 = vmatpush3.bf16.msra.mxu0 %v1836_v3 }
 0x10e   : > { %1586 = vmatprep.subr.bf16.mxu0 %v1837_v4 }
 0x111   : > { %1587 = vmatpush3.bf16.msra.mxu0 %v1838_v5 }
 0x112   : > { %1588 = vmatprep.subr.bf16.mxu0 %v1839_v6 }
 0x113   : > { %735 = vmatmul.mubr.bf16.gmra.mrb[44].mxu1 %v326_v54 }
 0x115   : > { %1589 = vmatpush3.bf16.msra.mxu0 %v1840_v7 }
 0x116   : > { %1590 = vmatprep.subr.bf16.mxu0 %v1841_v8 }
 0x119   : > { %1591 = vmatpush3.bf16.msra.mxu0 %v1842_v9 }
 0x18e   : > { %v2605_v10 = vpop.f32.mrb[0].mxu0  ;;  %v2607_v11 = vpop.f32.mrb[0].mxu1 }
 0x18f   : > { %v1518_v12 = vmul.f32 -1.442695, %v2605_v10  ;;  %v2610_v13 = vpop.f32.mrb[1].mxu0  ;;  %v2612_v14 = vpop.f32.mrb[1].mxu1  ;;  %v1534_v22 = vmul.f32 -1.442695, %v2607_v11 }
 0x190   : > { %v1519_v15 = vmul.f32 -1.442695, %v2610_v13  ;;  %v2615_v16 = vpop.f32.mrb[2].mxu0  ;;  %v2617_v17 = vpop.f32.mrb[2].mxu1  ;;  %v1535_v28 = vmul.f32 -1.442695, %v2612_v14 }
 0x191   : > { %1843 = vpow2.f32 %v1518_v12  ;;  %v1520_v18 = vmul.f32 -1.442695, %v2615_v16  ;;  %v2620_v19 = vpop.f32.mrb[3].mxu0  ;;  %v2622_v20 = vpop.f32.mrb[3].mxu1  ;;  %v1536_v35 = vmul.f32 -1.442695, %v2617_v17 }
 0x192   : > { %1845 = vpow2.f32 %v1519_v15  ;;  %v1521_v21 = vmul.f32 -1.442695, %v2620_v19  ;;  %v1537_v37 = vmul.f32 -1.442695, %v2622_v20 }
 0x193   : > { %1847 = vpow2.f32 %v1520_v18 }
 0x194   : > { %1849 = vpow2.f32 %v1521_v21 }
 0x196   : > { %v2626_v23 = vpop.f32.mrb[4].mxu0  ;;  %v2628_v24 = vpop.f32.mrb[4].mxu1 }
 0x197   : > { %v1522_v25 = vmul.f32 -1.442695, %v2626_v23  ;;  %v2631_v26 = vpop.f32.mrb[5].mxu0  ;;  %v2633_v27 = vpop.f32.mrb[5].mxu1  ;;  %v1538_v44 = vmul.f32 -1.442695, %v2628_v24 }
 0x198   : > { %v1523_v29 = vmul.f32 -1.442695, %v2631_v26  ;;  %v2637_v30 = vpop.f32.mrb[6].mxu0  ;;  %v2639_v31 = vpop.f32.mrb[6].mxu1  ;;  %v1539_v52 = vmul.f32 -1.442695, %v2633_v27 }
 0x199   : > { %1851 = vpow2.f32 %v1522_v25  ;;  %v1524_v32 = vmul.f32 -1.442695, %v2637_v30  ;;  %v2642_v33 = vpop.f32.mrb[7].mxu0  ;;  %v2644_v34 = vpop.f32.mrb[7].mxu1 }
 0x19a   : > { %1853 = vpow2.f32 %v1534_v22  ;;  %v1525_v4 = vmul.f32 -1.442695, %v2642_v33 }
 0x19b   : > { %v1844_v36 = vpop.eup %1843  ;;  %1855 = vpow2.f32 %v1523_v29 }
 0x19c   : > { %v841_v38 = vadd.f32 1.0, %v1844_v36  ;;  %1857 = vpow2.f32 %v1535_v28  ;;  %v1846_v39 = vpop.eup %1845 }
 0x19d   : > { %1859 = vpow2.f32 %v1524_v32  ;;  %v842_v40 = vadd.f32 1.0, %v1846_v39  ;;  %v1848_v43 = vpop.eup %1847 }
 0x19e   : > { %1861 = vpow2.f32 %v1536_v35  ;;  %v2648_v41 = vpop.f32.mrb[8].mxu0  ;;  %v2650_v42 = vpop.f32.mrb[8].mxu1  ;;  %v843_v46 = vadd.f32 1.0, %v1848_v43 }
 0x19f   : > { %1863 = vpow2.f32 %v1537_v37  ;;  %v2653_v45 = vpop.f32.mrb[9].mxu0  ;;  %v2655_v47 = vpop.f32.mrb[9].mxu1  ;;  %v1526_v18 = vmul.f32 -1.442695, %v2648_v41 }
 0x1a0   : > { %1865 = vrcp.f32 %v841_v38  ;;  %v2657_v48 = vpop.f32.mrb[10].mxu0  ;;  %v1850_v49 = vpop.eup %1849  ;;  %v1527_v29 = vmul.f32 -1.442695, %v2653_v45 }
 0x1a1   : > { %1867 = vrcp.f32 %v842_v40  ;;  %v2659_v50 = vpop.f32.mrb[10].mxu1  ;;  %v844_v51 = vadd.f32 1.0, %v1850_v49  ;;  %v2662_v53 = vpop.f32.mrb[11].mxu0  ;;  %v1528_v39 = vmul.f32 -1.442695, %v2657_v48 }
 0x1a2   : > { %1869 = vrcp.f32 %v843_v46  ;;  %v2664_v54 = vpop.f32.mrb[11].mxu1 }
 0x1a3   : > { %v1852_v55 = vpop.eup %1851  ;;  %1871 = vpow2.f32 %v1538_v44  ;;  %v1540_v44 = vmul.f32 -1.442695, %v2639_v31 }
 0x1a4   : > { %v1854_v56 = vpop.eup %1853  ;;  %1873 = vrcp.f32 %v844_v51  ;;  %v845_v57 = vadd.f32 1.0, %v1852_v55 }
 0x1a5   : > { %v1856_v58 = vpop.eup %1855  ;;  %1875 = vpow2.f32 %v1539_v52  ;;  %v857_v0 = vadd.f32 1.0, %v1854_v56 }
 0x1a6   : > { %v1858_v59 = vpop.eup %1857  ;;  %v846_v60 = vadd.f32 1.0, %v1856_v58  ;;  %v2666_v61 = vpop.f32.mrb[12].mxu0  ;;  %1877 = vrcp.f32 %v845_v57 }
 0x1a7   : > { %v2668_v62 = vpop.f32.mrb[12].mxu1  ;;  %v1860_v63 = vpop.eup %1859  ;;  %v858_v8 = vadd.f32 1.0, %v1858_v59 }
 0x1a8   : > { %v2670_v1 = vpop.f32.mrb[13].mxu0  ;;  %v1862_v2 = vpop.eup %1861  ;;  %v847_v3 = vadd.f32 1.0, %v1860_v63  ;;  %1879 = vrcp.f32 %v846_v60 }
 0x1a9   : > { %v2673_v5 = vpop.f32.mrb[13].mxu1  ;;  %v2675_v6 = vpop.f32.mrb[14].mxu0  ;;  %v859_v25 = vadd.f32 1.0, %v1862_v2 }
 0x1aa   : > { %v1864_v7 = vpop.eup %1863  ;;  %v2677_v9 = vpop.f32.mrb[14].mxu1  ;;  %1881 = vrcp.f32 %v847_v3 }
 0x1ab   : > { %v2679_v12 = vpop.f32.mrb[15].mxu0  ;;  %v1866_v15 = vpop.eup %1865  ;;  %1883 = vrcp.f32 %v857_v0  ;;  %v860_v36 = vadd.f32 1.0, %v1864_v7 }
 0x1ac   : > { %v2682_v21 = vpop.f32.mrb[15].mxu1  ;;  %v1868_v22 = vpop.eup %1867  ;;  %1885 = vpow2.f32 %v1525_v4  ;;  %v937_v35 = vmul.f32 %v1866_v15, %v2605_v10  ;;  %v1529_v10 = vmul.f32 -1.442695, %v2662_v53 }
 0x1ad   : > { %v1870_v28 = vpop.eup %1869  ;;  %1887 = vrcp.f32 %v858_v8  ;;  %v938_v38 = vmul.f32 %v1868_v22, %v2610_v13  ;;  %v1542_v22 = vmul.f32 -1.442695, %v2650_v42 }
 0x1ae   : > { %v1872_v32 = vpop.eup %1871  ;;  %1889 = vpow2.f32 %v1526_v18  ;;  %v666_v40 = vpop.f32.mrb[16].mxu1  ;;  %v939_v43 = vmul.f32 %v1870_v28, %v2615_v16  ;;  %v1530_v16 = vmul.f32 -1.442695, %v2666_v61 }
 0x1af   : > { %v1874_v37 = vpop.eup %1873  ;;  %1891 = vrcp.f32 %v859_v25  ;;  %v969_v46 = vmul.f32 %v937_v35, %v666_v40  ;;  %v668_v49 = vpop.f32.mrb[17].mxu1  ;;  %v861_v13 = vadd.f32 1.0, %v1872_v32 }
 0x1b0   : > { %v1876_v51 = vpop.eup %1875  ;;  %v940_v52 = vmul.f32 %v1874_v37, %v2620_v19  ;;  %1893 = vpow2.f32 %v1527_v29  ;;  %v970_v55 = vmul.f32 %v938_v38, %v668_v49  ;;  %v670_v56 = vpop.f32.mrb[18].mxu1  ;;  %v1541_v19 = vmul.f32 -1.442695, %v2644_v34 }
 0x1b1   : > { %1895 = vrcp.f32 %v860_v36  ;;  %v971_v57 = vmul.f32 %v939_v43, %v670_v56  ;;  %v672_v58 = vpop.f32.mrb[19].mxu1  ;;  %v1878_v59 = vpop.eup %1877  ;;  %v862_v0 = vadd.f32 1.0, %v1876_v51  ;;  %v1543_v37 = vmul.f32 -1.442695, %v2655_v47 }
 0x1b2   : > { %1897 = vpow2.f32 %v1528_v39  ;;  %v972_v60 = vmul.f32 %v940_v52, %v672_v58  ;;  %v1880_v63 = vpop.eup %1879  ;;  %v941_v8 = vmul.f32 %v1878_v59, %v2626_v23  ;;  %v1546_v58 = vmul.f32 -1.442695, %v2668_v62 }
 0x1b3   : > { %1899 = vpow2.f32 %v1540_v44  ;;  %v1017_v2 = vpack.c.bf16 %v971_v57, %v969_v46  ;;  %v942_v18 = vmul.f32 %v1880_v63, %v2631_v26  ;;  %v1544_v46 = vmul.f32 -1.442695, %v2659_v50 }
 0x1b4   : > { %v1882_v3 = vpop.eup %1881  ;;  %1901 = vpow2.f32 %v1529_v10  ;;  %v1018_v4 = vpack.c.bf16 %v972_v60, %v970_v55  ;;  %v1545_v55 = vmul.f32 -1.442695, %v2664_v54 }
 0x1b5   : > { %v2694_v7 = vpop.eup %1883  ;;  %1903 = vrcp.f32 %v861_v13  ;;  %v943_v29 = vmul.f32 %v1882_v3, %v2637_v30 }
 0x1b6   : > { %v1886_v15 = vpop.eup %1885  ;;  %1905 = vpow2.f32 %v1530_v16  ;;  %v676_v25 = vpop.f32.mrb[20].mxu1  ;;  %1193 = vmatprep.mubr.bf16.mxu0 %v1018_v4 }
 0x1b7   : > { %v2699_v28 = vpop.eup %1887  ;;  %1907 = vrcp.f32 %v862_v0  ;;  %v848_v32 = vadd.f32 1.0, %v1886_v15  ;;  %v2702_v35 = vmul.f32 %v941_v8, %v676_v25  ;;  %v678_v36 = vpop.f32.mrb[21].mxu1  ;;  %1194 = vmatmul.mubr.bf16.vlgmr.msra.gmra.mrb[16].mxu0 %v1017_v2  ;;  %v1531_v8 = vmul.f32 -1.442695, %v2670_v1 }
 0x1b8   : > { %v1890_v23 = vpop.eup %1889  ;;  %1909 = vpow2.f32 %v1541_v19  ;;  %v2705_v26 = vmul.f32 %v942_v18, %v678_v36  ;;  %v680_v38 = vpop.f32.mrb[22].mxu1 }
 0x1b9   : > { %v2707_v39 = vpop.eup %1891  ;;  %1911 = vrcp.f32 %v848_v32  ;;  %v849_v40 = vadd.f32 1.0, %v1890_v23  ;;  %v2709_v43 = vmul.f32 %v943_v29, %v680_v38  ;;  %v682_v44 = vpop.f32.mrb[23].mxu1  ;;  %v1532_v29 = vmul.f32 -1.442695, %v2675_v6 }
 0x1ba   : > { %v1894_v30 = vpop.eup %1893  ;;  %1913 = vpow2.f32 %v1542_v22  ;;  %v1547_v22 = vmul.f32 -1.442695, %v2673_v5  ;;  %v1548_v23 = vmul.f32 -1.442695, %v2677_v9  ;;  %v1533_v38 = vmul.f32 -1.442695, %v2679_v12 }
 0x1bb   : > { %v2712_v49 = vpop.eup %1895  ;;  %1915 = vrcp.f32 %v849_v40  ;;  %v850_v51 = vadd.f32 1.0, %v1894_v30  ;;  %v1019_v52 = vpack.c.bf16 %v2709_v43, %v2702_v35 }
 0x1bc   : > { %v1898_v10 = vpop.eup %1897  ;;  %1917 = vpow2.f32 %v1543_v37 }
 0x1bd   : > { %v1900_v56 = vpop.eup %1899  ;;  %1919 = vrcp.f32 %v850_v51  ;;  %v851_v13 = vadd.f32 1.0, %v1898_v10 }
 0x1be   : > { %v1902_v57 = vpop.eup %1901  ;;  %1921 = vpow2.f32 %v1544_v46  ;;  %v686_v59 = vpop.f32.mrb[24].mxu1  ;;  %v863_v2 = vadd.f32 1.0, %v1900_v56  ;;  %v1549_v46 = vmul.f32 -1.442695, %v2682_v21 }
 0x1bf   : > { %v2718_v16 = vpop.eup %1903  ;;  %1923 = vrcp.f32 %v851_v13  ;;  %v852_v60 = vadd.f32 1.0, %v1902_v57  ;;  %v688_v63 = vpop.f32.mrb[25].mxu1 }
 0x1c0   : > { %v1906_v0 = vpop.eup %1905  ;;  %1925 = vpow2.f32 %v1545_v55  ;;  %v690_v3 = vpop.f32.mrb[26].mxu1 }
 0x1c1   : > { %v2720_v19 = vpop.eup %1907  ;;  %1927 = vrcp.f32 %v852_v60  ;;  %v853_v4 = vadd.f32 1.0, %v1906_v0  ;;  %v692_v15 = vpop.f32.mrb[27].mxu1 }
 0x1c2   : > { %v1910_v18 = vpop.eup %1909  ;;  %1929 = vpow2.f32 %v1546_v58 }
 0x1c3   : > { %v1912_v25 = vpop.eup %1911  ;;  %1931 = vrcp.f32 %v853_v4  ;;  %v864_v56 = vadd.f32 1.0, %v1910_v18 }
 0x1c4   : > { %v1914_v32 = vpop.eup %1913  ;;  %1933 = vrcp.f32 %v863_v2  ;;  %v944_v36 = vmul.f32 %v1912_v25, %v2642_v33 }
 0x1c5   : > { %v1916_v37 = vpop.eup %1915  ;;  %1935 = vpow2.f32 %v1531_v8  ;;  %v865_v4 = vadd.f32 1.0, %v1914_v32  ;;  %v953_v32 = vmul.f32 %v2694_v7, %v2607_v11 }
 0x1c6   : > { %v1918_v40 = vpop.eup %1917  ;;  %v945_v30 = vmul.f32 %v1916_v37, %v2648_v41  ;;  %1937 = vpow2.f32 %v1547_v22  ;;  %v976_v51 = vmul.f32 %v944_v36, %v682_v44  ;;  %v696_v10 = vpop.f32.mrb[28].mxu1 }
 0x1c7   : > { %v1920_v55 = vpop.eup %1919  ;;  %1939 = vpow2.f32 %v1532_v29  ;;  %v2730_v13 = vpop.f32.mrb[29].mxu1 }
 0x1c8   : > { %v1922_v33 = vpop.eup %1921  ;;  %v946_v57 = vmul.f32 %v1920_v55, %v2653_v45  ;;  %1941 = vpow2.f32 %v1548_v23  ;;  %v1020_v58 = vpack.c.bf16 %v976_v51, %v2705_v26  ;;  %v977_v60 = vmul.f32 %v945_v30, %v686_v59  ;;  %v2734_v0 = vpop.f32.mrb[30].mxu1 }
 0x1c9   : > { %v1924_v41 = vpop.eup %1923  ;;  %1943 = vpow2.f32 %v1533_v38  ;;  %v2736_v2 = vpop.f32.mrb[31].mxu1  ;;  %v866_v45 = vadd.f32 1.0, %v1918_v40  ;;  %v867_v36 = vadd.f32 1.0, %v1922_v33 }
 0x1ca   : > { %v1926_v44 = vpop.eup %1925  ;;  %v947_v8 = vmul.f32 %v1924_v41, %v2657_v48  ;;  %1945 = vpow2.f32 %v1549_v46  ;;  %1201 = vmatprep.mubr.bf16.mxu0 %v1020_v58  ;;  %v978_v18 = vmul.f32 %v946_v57, %v688_v63  ;;  %v954_v48 = vmul.f32 %v2699_v28, %v2612_v14 }
 0x1cb   : > { %v1928_v22 = vpop.eup %1927  ;;  %1947 = vrcp.f32 %v864_v56  ;;  %1202 = vmatmul.mubr.bf16.gmra.mrb[20].mxu0 %v1019_v52  ;;  %v955_v63 = vmul.f32 %v2707_v39, %v2617_v17  ;;  %v868_v11 = vadd.f32 1.0, %v1926_v44  ;;  %v957_v41 = vmul.f32 %v2718_v16, %v2628_v24 }
 0x1cc   : > { %v1930_v26 = vpop.eup %1929  ;;  %v948_v59 = vmul.f32 %v1928_v22, %v2662_v53  ;;  %v979_v25 = vmul.f32 %v947_v8, %v690_v3  ;;  %1949 = vrcp.f32 %v865_v4  ;;  %v956_v3 = vmul.f32 %v2712_v49, %v2622_v20 }
 0x1cd   : > { %v1932_v29 = vpop.eup %1931  ;;  %1951 = vrcp.f32 %v866_v45  ;;  %v869_v33 = vadd.f32 1.0, %v1930_v26  ;;  %v958_v4 = vmul.f32 %v2720_v19, %v2633_v27 }
 0x1ce   : > { %v1934_v23 = vpop.eup %1933  ;;  %v949_v35 = vmul.f32 %v1932_v29, %v2666_v61  ;;  %v1021_v43 = vpack.c.bf16 %v979_v25, %v977_v60  ;;  %v980_v52 = vmul.f32 %v948_v59, %v692_v15  ;;  %v706_v37 = vpop.f32.mrb[32].mxu1  ;;  %1953 = vrcp.f32 %v867_v36 }
 0x1cf   : > { %v1936_v53 = vpop.eup %1935  ;;  %v2752_v7 = vmul.f32 %v953_v32, %v706_v37  ;;  %v708_v14 = vpop.f32.mrb[33].mxu1  ;;  %v959_v22 = vmul.f32 %v1934_v23, %v2639_v31 }
 0x1d0   : > { %v1938_v28 = vpop.eup %1937  ;;  %v854_v38 = vadd.f32 1.0, %v1936_v53  ;;  %v1022_v17 = vpack.c.bf16 %v980_v52, %v978_v18  ;;  %v2754_v39 = vmul.f32 %v949_v35, %v696_v10  ;;  %v2756_v40 = vmul.f32 %v954_v48, %v708_v14  ;;  %v710_v61 = vpop.f32.mrb[34].mxu1 }
 0x1d1   : > { %v1940_v30 = vpop.eup %1939  ;;  %v2758_v15 = vmul.f32 %v955_v63, %v710_v61  ;;  %v712_v46 = vpop.f32.mrb[35].mxu1  ;;  %v870_v44 = vadd.f32 1.0, %v1938_v28 }
 0x1d2   : > { %v1942_v51 = vpop.eup %1941  ;;  %1955 = vrcp.f32 %v854_v38  ;;  %v855_v20 = vadd.f32 1.0, %v1940_v30  ;;  %1209 = vmatprep.mubr.bf16.mxu0 %v1022_v17  ;;  %v2760_v49 = vmul.f32 %v956_v3, %v712_v46 }
 0x1d3   : > { %v1944_v55 = vpop.eup %1943  ;;  %1957 = vrcp.f32 %v868_v11  ;;  %1210 = vmatmul.mubr.bf16.gmra.mrb[24].mxu0 %v1021_v43  ;;  %v1025_v10 = vpack.c.bf16 %v2758_v15, %v2752_v7  ;;  %v871_v8 = vadd.f32 1.0, %v1942_v51  ;;  %v1003_v15 = vld [vmem:[#allocation2 + $0x10] sm:$0xff] }
 0x1d4   : > { %v1946_v56 = vpop.eup %1945  ;;  %1959 = vrcp.f32 %v855_v20  ;;  %v856_v57 = vadd.f32 1.0, %v1944_v55  ;;  %v1026_v58 = vpack.c.bf16 %v2760_v49, %v2756_v40 }
 0x1d5   : > { %v1948_v60 = vpop.eup %1947  ;;  %v872_v45 = vadd.f32 1.0, %v1946_v56 }
 0x1d6   : > { %1961 = vrcp.f32 %v856_v57  ;;  %v716_v18 = vpop.f32.mrb[36].mxu1  ;;  %v1950_v25 = vpop.eup %1949  ;;  %v960_v29 = vmul.f32 %v1948_v60, %v2644_v34 }
 0x1d7   : > { %v2771_v26 = vmul.f32 %v957_v41, %v716_v18  ;;  %v718_v59 = vpop.f32.mrb[37].mxu1  ;;  %1963 = vrcp.f32 %v869_v33  ;;  %v1952_v24 = vpop.eup %1951  ;;  %v961_v43 = vmul.f32 %v1950_v25, %v2650_v42 }
 0x1d8   : > { %v990_v32 = vmul.f32 %v958_v4, %v718_v59  ;;  %v720_v48 = vpop.f32.mrb[38].mxu1  ;;  %1965 = vrcp.f32 %v870_v44  ;;  %v1954_v19 = vpop.eup %1953  ;;  %v962_v37 = vmul.f32 %v1952_v24, %v2655_v47 }
 0x1d9   : > { %v991_v16 = vmul.f32 %v959_v22, %v720_v48  ;;  %v722_v63 = vpop.f32.mrb[39].mxu1  ;;  %1967 = vrcp.f32 %v871_v8  ;;  %v963_v3 = vmul.f32 %v1954_v19, %v2659_v50 }
 0x1da   : > { %v992_v27 = vmul.f32 %v960_v29, %v722_v63  ;;  %1969 = vrcp.f32 %v872_v45  ;;  %v1004_v63 = vld [vmem:[#allocation2 + $0x18] sm:$0xff] }
 0x1db   : > { %v1027_v31 = vpack.c.bf16 %v991_v16, %v2771_v26 }
 0x1dc   : > { %v1956_v36 = vpop.eup %1955  ;;  %v1028_v23 = vpack.c.bf16 %v992_v27, %v990_v32 }
 0x1dd   : > { %v1958_v35 = vpop.eup %1957  ;;  %v950_v34 = vmul.f32 %v1956_v36, %v2670_v1 }
 0x1de   : > { %v1960_v52 = vpop.eup %1959  ;;  %v726_v53 = vpop.f32.mrb[40].mxu1  ;;  %v964_v61 = vmul.f32 %v1958_v35, %v2664_v54  ;;  %v1005_v35 = vld [vmem:[#allocation2 + $0x20] sm:$0xff] }
 0x1df   : > { %v951_v11 = vmul.f32 %v1960_v52, %v2675_v6  ;;  %v982_v14 = vmul.f32 %v950_v34, %v2730_v13  ;;  %v993_v28 = vmul.f32 %v961_v43, %v726_v53  ;;  %v728_v38 = vpop.f32.mrb[41].mxu1 }
 0x1e0   : > { %v1962_v17 = vpop.eup %1961  ;;  %v994_v30 = vmul.f32 %v962_v37, %v728_v38  ;;  %v730_v46 = vpop.f32.mrb[42].mxu1  ;;  %v1006_v37 = vld [vmem:[#allocation2 + $0x28] sm:$0xff]  ;;  %v1007_v38 = vld [vmem:[#allocation2 + $0x30] sm:$0xff] }
 0x1e1   : > { %v952_v42 = vmul.f32 %v1962_v17, %v2679_v12  ;;  %v983_v1 = vmul.f32 %v951_v11, %v2734_v0  ;;  %v995_v51 = vmul.f32 %v963_v3, %v730_v46  ;;  %v732_v47 = vpop.f32.mrb[43].mxu1  ;;  %v1964_v20 = vpop.eup %1963  ;;  %v1008_v46 = vld [vmem:[#allocation2 + $0x38] sm:$0xff] }
 0x1e2   : > { %v996_v55 = vmul.f32 %v964_v61, %v732_v47  ;;  %v1966_v50 = vpop.eup %1965  ;;  %v965_v54 = vmul.f32 %v1964_v20, %v2668_v62 }
 0x1e3   : > { %v1023_v6 = vpack.c.bf16 %v983_v1, %v2754_v39  ;;  %v984_v13 = vmul.f32 %v952_v42, %v2736_v2  ;;  %v1029_v56 = vpack.c.bf16 %v995_v51, %v993_v28  ;;  %v1968_v33 = vpop.eup %1967  ;;  %v966_v12 = vmul.f32 %v1966_v50, %v2673_v5 }
 0x1e4   : > { %v1030_v57 = vpack.c.bf16 %v996_v55, %v994_v30  ;;  %v1970_v60 = vpop.eup %1969  ;;  %v967_v0 = vmul.f32 %v1968_v33, %v2677_v9  ;;  %v1009_v55 = vld [vmem:[#allocation2 + $0x40] sm:$0xff] }
 0x1e5   : > { %v1024_v41 = vpack.c.bf16 %v984_v13, %v982_v14  ;;  %v968_v18 = vmul.f32 %v1970_v60, %v2682_v21  ;;  %v1001_v21 = vld [vmem:[#allocation2] sm:$0xff] }
 0x1e6   : > { %v736_v44 = vpop.f32.mrb[44].mxu1 }
 0x1e7   : > { %1217 = vmatprep.mubr.bf16.mxu0 %v1024_v41  ;;  %v997_v4 = vmul.f32 %v965_v54, %v736_v44  ;;  %v738_v8 = vpop.f32.mrb[45].mxu1 }
 0x1e8   : > { %1218 = vmatmul.mubr.bf16.gmra.mrb[28].mxu0 %v1023_v6  ;;  %v998_v39 = vmul.f32 %v966_v12, %v738_v8  ;;  %v740_v2 = vpop.f32.mrb[46].mxu1  ;;  %v1011_v12 = vld [vmem:[#allocation2 + $0x50] sm:$0xff]  ;;  %v1012_v8 = vld [vmem:[#allocation2 + $0x58] sm:$0xff] }
 0x1e9   : > { %1225 = vmatprep.mubr.bf16.mxu0 %v1026_v58  ;;  %v999_v22 = vmul.f32 %v967_v0, %v740_v2  ;;  %v742_v62 = vpop.f32.mrb[47].mxu1  ;;  %v1002_v58 = vld [vmem:[#allocation2 + $0x8] sm:$0xff] }
 0x1ea   : > { %v1000_v45 = vmul.f32 %v968_v18, %v742_v62 }
 0x1eb   : > { %v1031_v26 = vpack.c.bf16 %v999_v22, %v997_v4 }
 0x1ec   : > { %v1032_v5 = vpack.c.bf16 %v1000_v45, %v998_v39  ;;  %v1013_v45 = vld [vmem:[#allocation2 + $0x60] sm:$0xff] }
 0x1f0   : > { %1226 = vmatmul.mubr.bf16.gmra.mrb[32].mxu0 %v1025_v10 }
 0x1f1   : > { %1233 = vmatprep.mubr.bf16.mxu0 %v1028_v23 }
 0x1f8   : > { %1234 = vmatmul.mubr.bf16.gmra.mrb[36].mxu0 %v1027_v31 }
 0x1f9   : > { %1241 = vmatprep.mubr.bf16.mxu0 %v1030_v57 }
 0x200   : > { %1242 = vmatmul.mubr.bf16.gmra.mrb[40].mxu0 %v1029_v56  ;;  %v1010_v56 = vld [vmem:[#allocation2 + $0x48] sm:$0xff] }
 0x201   : > { %1249 = vmatprep.mubr.bf16.mxu0 %v1032_v5 }
 0x208   : > { %1250 = vmatmul.mubr.bf16.gmra.mrb[44].mxu0 %v1031_v26 }
 0x28a   : > { %v1592_v9 = vpop.f32.mrb[16].mxu0 }
 0x28b   : > { %v1593_v59 = vpop.f32.mrb[17].mxu0 }
 0x28c   : > { %v1594_v40 = vadd.f32 %v1593_v59, %v1592_v9  ;;  %v1595_v49 = vpop.f32.mrb[18].mxu0 }
 0x28d   : > { %v1596_v25 = vpop.f32.mrb[19].mxu0 }
 0x28e   : > { %v1258_v29 = vadd.f32 %v1594_v40, %v1001_v21  ;;  %v1597_v32 = vadd.f32 %v1596_v25, %v1595_v49  ;;  %v1014_v21 = vld [vmem:[#allocation2 + $0x68] sm:$0xff] }
 0x290   : > { %1274 = vst [vmem:[#allocation2] sm:$0xff] %v1258_v29  ;;  %v1259_v48 = vadd.f32 %v1597_v32, %v1002_v58  ;;  %v1015_v29 = vld [vmem:[#allocation2 + $0x70] sm:$0xff] }
 0x292   : > { %1275 = vst [vmem:[#allocation2 + $0x8] sm:$0xff] %v1259_v48 }
 0x29e   : > { %v1598_v7 = vpop.f32.mrb[20].mxu0 }
 0x29f   : > { %v1599_v10 = vpop.f32.mrb[21].mxu0 }
 0x2a0   : > { %v1600_v24 = vadd.f32 %v1599_v10, %v1598_v7  ;;  %v1601_v16 = vpop.f32.mrb[22].mxu0 }
 0x2a1   : > { %v1602_v27 = vpop.f32.mrb[23].mxu0 }
 0x2a2   : > { %v1260_v19 = vadd.f32 %v1600_v24, %v1003_v15  ;;  %v1603_v31 = vadd.f32 %v1602_v27, %v1601_v16  ;;  %v1016_v15 = vld [vmem:[#allocation2 + $0x78] sm:$0xff]  ;;  %v1294_v27 = vld [vmem:[#allocation2] sm:$0xff] (!%p1566_p12) }
 0x2a3   : > { %1310 = vst [vmem:[%s2514_s3] sm:$0xff] (!%p1566_p12), %v1294_v27 }
 0x2a4   : > { %1276 = vst [vmem:[#allocation2 + $0x10] sm:$0xff] %v1260_v19  ;;  %v1261_v36 = vadd.f32 %v1603_v31, %v1004_v63  ;;  %v1295_v19 = vld [vmem:[#allocation2 + $0x8] sm:$0xff] (!%p1566_p12) }
 0x2a5   : > { %1311 = vst [vmem:[%s2514_s3 + $0x8] sm:$0xff] (!%p1566_p12), %v1295_v19 }
 0x2a6   : > { %1277 = vst [vmem:[#allocation2 + $0x18] sm:$0xff] %v1261_v36  ;;  %v1604_v23 = vpop.f32.mrb[24].mxu0 }
 0x2a7   : > { %v1605_v43 = vpop.f32.mrb[25].mxu0 }
 0x2a8   : > { %v1606_v34 = vadd.f32 %v1605_v43, %v1604_v23  ;;  %v1607_v52 = vpop.f32.mrb[26].mxu0 }
 0x2a9   : > { %v1608_v53 = vpop.f32.mrb[27].mxu0 }
 0x2aa   : > { %v1262_v3 = vadd.f32 %v1606_v34, %v1005_v35  ;;  %v1609_v11 = vadd.f32 %v1608_v53, %v1607_v52 }
 0x2ab   : > { %v1296_v31 = vld [vmem:[#allocation2 + $0x10] sm:$0xff] (!%p1566_p12) }
 0x2ac   : > { %1278 = vst [vmem:[#allocation2 + $0x20] sm:$0xff] %v1262_v3  ;;  %v1263_v14 = vadd.f32 %v1609_v11, %v1006_v37  ;;  %1312 = vst [vmem:[%s2514_s3 + $0x10] sm:$0xff] (!%p1566_p12), %v1296_v31 }
 0x2ad   : > { %v1297_v36 = vld [vmem:[#allocation2 + $0x18] sm:$0xff] (!%p1566_p12) }
 0x2ae   : > { %1279 = vst [vmem:[#allocation2 + $0x28] sm:$0xff] %v1263_v14  ;;  %1313 = vst [vmem:[%s2514_s3 + $0x18] sm:$0xff] (!%p1566_p12), %v1297_v36 }
 0x2b3   : > { %v1298_v23 = vld [vmem:[#allocation2 + $0x20] sm:$0xff] (!%p1566_p12) }
 0x2b4   : > { %1314 = vst [vmem:[%s2514_s3 + $0x20] sm:$0xff] (!%p1566_p12), %v1298_v23 }
 0x2b5   : > { %v1299_v35 = vld [vmem:[#allocation2 + $0x28] sm:$0xff] (!%p1566_p12) }
 0x2b6   : > { %1315 = vst [vmem:[%s2514_s3 + $0x28] sm:$0xff] (!%p1566_p12), %v1299_v35 }
 0x2bb   : > { %v1610_v28 = vpop.f32.mrb[28].mxu0 }
 0x2bc   : > { %v1611_v17 = vpop.f32.mrb[29].mxu0 }
 0x2bd   : > { %v1612_v61 = vadd.f32 %v1611_v17, %v1610_v28  ;;  %v1613_v30 = vpop.f32.mrb[30].mxu0 }
 0x2be   : > { %v1614_v42 = vpop.f32.mrb[31].mxu0 }
 0x2bf   : > { %v1264_v1 = vadd.f32 %v1612_v61, %v1007_v38  ;;  %v1615_v51 = vadd.f32 %v1614_v42, %v1613_v30 }
 0x2c1   : > { %1280 = vst [vmem:[#allocation2 + $0x30] sm:$0xff] %v1264_v1  ;;  %v1265_v47 = vadd.f32 %v1615_v51, %v1008_v46 }
 0x2c3   : > { %1281 = vst [vmem:[#allocation2 + $0x38] sm:$0xff] %v1265_v47  ;;  %v1616_v20 = vpop.f32.mrb[32].mxu0 }
 0x2c4   : > { %v1617_v50 = vpop.f32.mrb[33].mxu0 }
 0x2c5   : > { %v1618_v6 = vadd.f32 %v1617_v50, %v1616_v20  ;;  %v1619_v13 = vpop.f32.mrb[34].mxu0 }
 0x2c6   : > { %v1620_v33 = vpop.f32.mrb[35].mxu0 }
 0x2c7   : > { %v1266_v57 = vadd.f32 %v1618_v6, %v1009_v55  ;;  %v1621_v60 = vadd.f32 %v1620_v33, %v1619_v13 }
 0x2c8   : > { %v1300_v43 = vld [vmem:[#allocation2 + $0x30] sm:$0xff] (!%p1566_p12) }
 0x2c9   : > { %1282 = vst [vmem:[#allocation2 + $0x40] sm:$0xff] %v1266_v57  ;;  %v1267_v54 = vadd.f32 %v1621_v60, %v1010_v56  ;;  %1316 = vst [vmem:[%s2514_s3 + $0x30] sm:$0xff] (!%p1566_p12), %v1300_v43 }
 0x2ca   : > { %v1301_v34 = vld [vmem:[#allocation2 + $0x38] sm:$0xff] (!%p1566_p12) }
 0x2cb   : > { %1283 = vst [vmem:[#allocation2 + $0x48] sm:$0xff] %v1267_v54  ;;  %v1622_v41 = vpop.f32.mrb[36].mxu0  ;;  %1317 = vst [vmem:[%s2514_s3 + $0x38] sm:$0xff] (!%p1566_p12), %v1301_v34 }
 0x2cc   : > { %v1623_v44 = vpop.f32.mrb[37].mxu0 }
 0x2cd   : > { %v1624_v0 = vadd.f32 %v1623_v44, %v1622_v41  ;;  %v1625_v4 = vpop.f32.mrb[38].mxu0 }
 0x2ce   : > { %v1626_v18 = vpop.f32.mrb[39].mxu0 }
 0x2cf   : > { %v1268_v39 = vadd.f32 %v1624_v0, %v1011_v12  ;;  %v1627_v2 = vadd.f32 %v1626_v18, %v1625_v4 }
 0x2d0   : > { %v1302_v52 = vld [vmem:[#allocation2 + $0x40] sm:$0xff] (!%p1566_p12) }
 0x2d1   : > { %1284 = vst [vmem:[#allocation2 + $0x50] sm:$0xff] %v1268_v39  ;;  %v1269_v22 = vadd.f32 %v1627_v2, %v1012_v8  ;;  %1318 = vst [vmem:[%s2514_s3 + $0x40] sm:$0xff] (!%p1566_p12), %v1302_v52 }
 0x2d2   : > { %v1303_v37 = vld [vmem:[#allocation2 + $0x48] sm:$0xff] (!%p1566_p12) }
 0x2d3   : > { %1285 = vst [vmem:[#allocation2 + $0x58] sm:$0xff] %v1269_v22  ;;  %v1628_v62 = vpop.f32.mrb[40].mxu0  ;;  %1319 = vst [vmem:[%s2514_s3 + $0x48] sm:$0xff] (!%p1566_p12), %v1303_v37 }
 0x2d4   : > { %v1629_v26 = vpop.f32.mrb[41].mxu0 }
 0x2d5   : > { %v1630_v5 = vadd.f32 %v1629_v26, %v1628_v62  ;;  %v1631_v9 = vpop.f32.mrb[42].mxu0 }
 0x2d6   : > { %v1632_v59 = vpop.f32.mrb[43].mxu0 }
 0x2d7   : > { %v1270_v40 = vadd.f32 %v1630_v5, %v1013_v45  ;;  %v1633_v49 = vadd.f32 %v1632_v59, %v1631_v9 }
 0x2d8   : > { %v1304_v53 = vld [vmem:[#allocation2 + $0x50] sm:$0xff] (!%p1566_p12) }
 0x2d9   : > { %1286 = vst [vmem:[#allocation2 + $0x60] sm:$0xff] %v1270_v40  ;;  %v1271_v58 = vadd.f32 %v1633_v49, %v1014_v21  ;;  %1320 = vst [vmem:[%s2514_s3 + $0x50] sm:$0xff] (!%p1566_p12), %v1304_v53 }
 0x2da   : > { %v1305_v3 = vld [vmem:[#allocation2 + $0x58] sm:$0xff] (!%p1566_p12) }
 0x2db   : > { %1287 = vst [vmem:[#allocation2 + $0x68] sm:$0xff] %v1271_v58  ;;  %v1634_v25 = vpop.f32.mrb[44].mxu0  ;;  %1321 = vst [vmem:[%s2514_s3 + $0x58] sm:$0xff] (!%p1566_p12), %v1305_v3 }
 0x2dc   : > { %v1635_v32 = vpop.f32.mrb[45].mxu0 }
 0x2dd   : > { %v1636_v48 = vadd.f32 %v1635_v32, %v1634_v25  ;;  %v1637_v7 = vpop.f32.mrb[46].mxu0  ;;  %1293 = sbr.rel (%p1566_p12) target bundleno = 748 (0x2ec), region = 52 }
 0x2de   : > { %v1638_v10 = vpop.f32.mrb[47].mxu0 }
 0x2df   : > { %v1272_v24 = vadd.f32 %v1636_v48, %v1015_v29  ;;  %v1639_v16 = vadd.f32 %v1638_v10, %v1637_v7 }
 0x2e0   : > { %v1306_v11 = vld [vmem:[#allocation2 + $0x60] sm:$0xff] (!%p1566_p12) }
 0x2e1   : > { %1288 = vst [vmem:[#allocation2 + $0x70] sm:$0xff] %v1272_v24  ;;  %v1273_v63 = vadd.f32 %v1639_v16, %v1016_v15  ;;  %1322 = vst [vmem:[%s2514_s3 + $0x60] sm:$0xff] (!%p1566_p12), %v1306_v11 }
 0x2e2   : > { %v1307_v14 = vld [vmem:[#allocation2 + $0x68] sm:$0xff] (!%p1566_p12) }
 0x2e3   : > { %1289 = vst [vmem:[#allocation2 + $0x78] sm:$0xff] %v1273_v63  ;;  %1323 = vst [vmem:[%s2514_s3 + $0x68] sm:$0xff] (!%p1566_p12), %v1307_v14 }
 0x2e8   : > { %v1308_v28 = vld [vmem:[#allocation2 + $0x70] sm:$0xff] }
 0x2e9   : > { %1324 = vst [vmem:[%s2514_s3 + $0x70] sm:$0xff] %v1308_v28 }
 0x2ea   : > { %v1309_v38 = vld [vmem:[#allocation2 + $0x78] sm:$0xff] }
 0x2eb   : > { %1325 = vst [vmem:[%s2514_s3 + $0x78] sm:$0xff] %v1309_v38 }
 0x2ec PF: > { %s1575_s18 = sshll.u32 %s2175_s19, 11  ;;  %s2929_s9 = sld [smem:[#allocation21_spill]] }
 0x2ed   : > { %s1340_s12 = sshll.u32 %s2514_s3, 4  ;;  %s1327_s30 = scalar_lea.sflag [#allocation5], %s2494_s21  ;;  %s2820_s12 = int_to_ptr.vmem [resolvable:$true] %s1340_s12 }
 0x2ee   : > { %s2061_s0 = scalar_lea.vmem %s2820_s12, 2048  ;;  %p2930_p11 = scmp.ne.s32.totalorder %s2917_s4, 0 }
 0x2ef   : > { %p2062_p13 = scmp.ne.s32.totalorder %s2820_s12, %s2061_s0  ;;  %s2201_s1 = smov [#allocation9]  }
 0x2f0   : > { %s2065_s26 = sshll.u32 %s2201_s1, 4  ;;  %s2066_s26 = int_to_ptr.vmem [resolvable:$false] %s2065_s26 }
 0x2f1   : > { %p2063_p6 = pnand %p2062_p13, %p2930_p11  ;;  %s2067_s19 = scalar_lea.vmem %s2066_s26, 4096 }
 0x2f2   : > { %s2817_s7 = scalar_lea.hbm %s2929_s9, %s1575_s18  ;;  %p2068_p5 = scmp.lt.s32.totalorder %s2820_s12, %s2066_s26 }
 0x2f3   : > { %p2064_p10 = pneg %p2063_p6  ;;  %p2069_p1 = scmp.lt.s32.totalorder %s2067_s19, %s2061_s0 }
 0x2f5   : > { %p2070_p0 = por %p2069_p1, %p2068_p5 }
 0x2f7   : > { %p2071_p9 = pnand %p2070_p0, %p2064_p10 }
 0x2f9   : > { %2074 = shalt.err (!%p2071_p9)
}
 0x2fa   : > { %s2075_s8 = scalar_lea.hbm %s2817_s7, 2048  ;;  %s2079_s11 = scalar_lea.hbm %s2929_s9, 4096 }
 0x2fb   : > { %p2076_p2 = scmp.ne.s32.totalorder %s2817_s7, %s2075_s8  ;;  %p2080_p7 = scmp.lt.u32.totalorder %s2817_s7, %s2929_s9 }
 0x2fc   : > { %p2081_p8 = scmp.lt.u32.totalorder %s2079_s11, %s2075_s8  ;;  %p2083_p13 = scmp.lt.u32.totalorder %s2075_s8, %s2817_s7 }
 0x2fd   : > { %p2077_p3 = pnand %p2076_p2, %p2930_p11 }
 0x2fe   : > { %p2082_p12 = por %p2081_p8, %p2080_p7 }
 0x2ff   : > { %p2078_p4 = pneg %p2077_p3 }
 0x300   : > { %p2084_p6 = por %p2083_p13, %p2082_p12 }
 0x302   : > { %p2085_p10 = pnand %p2084_p6, %p2078_p4 }
 0x304   : > { %2088 = shalt.err (!%p2085_p10)
}
 0x305   : > { %s2202_s17 = smov 128   ;;  %s2203_s28 = smov 8  }
 0x306   : > { %1662 = dma.vmem_to_hbm [thread:$0]  (%p2930_p11), %s2820_s12, 2048, %s2817_s7, %s1327_s30, %s2202_s17, %s2202_s17, %s2203_s28  }
 0x307 PF: > { %p1679_p5 = scmp.ge.s32.totalorder %s2187_s22, 2  ;;  %s1355_s29 = sand.u32 1, %s2159_s15  }
 0x308   : > { %p2931_p1 = scmp.ne.s32.totalorder %s2919_s23, 0  ;;  %s1356_s3 = scalar_lea.sflag [#allocation5], %s1355_s29 }
 0x30a   : > { %p1675_p0 = pnand %p1679_p5, %p2931_p1 }
 0x30c   : > { %2142 = dma.done.wait (!%p1675_p0), %s1356_s3, 2048  }
 0x30d   : > { %2144 = vsyncadd (!%p1675_p0), %s1356_s3, 4294965248  ;;  %s22_s22 = sadd.s32 1, %s2187_s22   ;;  %s2932_s18 = sld [smem:[#allocation16_spill]] }
 0x30e   : > { %p19_p9 = scmp.ge.s32.totalorder %s22_s22, 6   ;;  %s2933_s4 = sld [smem:[#allocation13_spill]] }
 0x30f   : > { %s2934_s17 = sld [smem:[#allocation18_spill]]  ;;  %s2935_s19 = sld [smem:[#allocation14_spill]] }
 0x310   : > { %s2936_s21 = sld [smem:[#allocation15_spill]]  ;;  %s2937_s27 = sld [smem:[#allocation17_spill]] }
 0x311   : > { %s2938_s12 = smov %s2151_s13  ;;  %s2939_s13 = smov %s2155_s14 }
 0x312   : > { %s2941_s15 = smov %s2163_s16  ;;  %21 = sbr.rel (!%p19_p9) target bundleno = 15 (0xf), region = 109 }
 0x313   : > { %s2940_s14 = smov %s2932_s18  ;;  %s2943_s18 = smov %s2179_s20 }
 0x314   : > { %s2942_s16 = smov %s2933_s4 }
 0x316   : > { %s2944_s20 = smov %s2936_s21  ;;  %s2945_s21 = smov %s2937_s27 }
 0x319   :  { %1361 = vsyncpa [#allocation4], 1 }
 0x31a   :  { %1363 = vsyncpa [#allocation4 + $0x1], 1 }
 0x31b   :  { %1364 = vsyncpa [#allocation7], 1 }
 0x31c   :  { %1366 = vsyncpa [#allocation7 + $0x1], 1 }
 0x31d   :  { %1367 = vsyncpa [#allocation5], 1 }
 0x31e   :  { %1369 = vsyncpa [#allocation5 + $0x1], 1 }

</bundles_post_ra>
